<compile_context>
chip_gen: v7x
topology: tpu7x:2x2x1
jax: 0.10.0
libtpu: 0.0.40
codegen_flags: <defaults>
</compile_context>

<pallas_src>
import math
import numpy as np
import jax
import jax.numpy as jnp
from jax import lax
from jax.experimental import pallas as pl
from jax.experimental.pallas import tpu as pltpu


# Modest explicit VMEM budget: works on v7x (64 MiB/TC) as well as v5e/v6e.
_COMPILER_PARAMS = pltpu.CompilerParams(vmem_limit_bytes=32 * 1024 * 1024)


def _unroll_factor(T):
    """Largest of (4, 2, 1) dividing T: manual unroll window for the T loop."""
    for u in (4, 2, 1):
        if T % u == 0:
            return u
    return 1


# ----------------------------------------------------------------------------
# In-kernel building blocks
# ----------------------------------------------------------------------------
def _input_projection(x_ref, wih_ref, b_ref, pre_ref):
    """pre[t] = x[t] @ W_ih(all dirs) + b, computed as ONE fused MXU matmul.

    x_ref:   (nd_in, T*B, Din)   per-input-direction activations
    wih_ref: (nd_in, Din, nd*4H) gate-axis-fused weights, row-split per
                                 input direction (fwd rows first, then rev)
    b_ref:   (1, nd*4H)          combined bias (b_ih + b_hh), dir-major
    pre_ref: (T, B, nd*4H)       VMEM scratch, filled time-slab by time-slab
                                 so the recurrence does leading-index loads.
    """
    T, B, _ = pre_ref.shape
    nd_in = x_ref.shape[0]
    acc = None
    for di in range(nd_in):  # static: 1 or 2 input-direction halves
        # bf16 MXU inputs, f32 accumulation.
        m = jnp.dot(x_ref[di].astype(jnp.bfloat16),
                    wih_ref[di].astype(jnp.bfloat16),
                    preferred_element_type=jnp.float32)
        acc = m if acc is None else acc + m
    acc = acc + b_ref[...]                       # bias folded in once
    # Scatter (T*B, nd*4H) into per-timestep slabs: static sublane slices +
    # static leading-index stores only (no dynamic sublane indexing needed).
    # TODO(synk): at realistic T fold this into a T-chunked pipelined grid.
    for tt in range(T):
        pre_ref[tt] = acc[tt * B:(tt + 1) * B, :]


def _lstm_cell(pre_g, h, c, whh, H):
    """One LSTM cell step. pre_g: (B, 4H) x-part + bias for this direction."""
    gates = pre_g + jnp.dot(h, whh, preferred_element_type=jnp.float32)
    # Full-width transcendentals: one sigmoid + one tanh over (B, 4H), then
    # lane slices for i/f/g/o (PyTorch gate order).
    sig = jax.nn.sigmoid(gates)
    tnh = jnp.tanh(gates)
    c_new = sig[:, H:2 * H] * c + sig[:, 0:H] * tnh[:, 2 * H:3 * H]
    h_new = sig[:, 3 * H:4 * H] * jnp.tanh(c_new)
    return h_new, c_new


# ----------------------------------------------------------------------------
# Pallas kernels (one per LSTM layer; last layer also fuses sum + fc)
# ----------------------------------------------------------------------------
def bilstm_layer_kernel(x_ref, wih_ref, whh_ref, b_ref, out_ref, pre_ref):
    """One full (bi)LSTM layer over the whole sequence, fused in one call.

    x_ref:   (nd_in, T*B, Din)
    wih_ref: (nd_in, Din, nd*4H)
    whh_ref: (nd, H, 4H)
    b_ref:   (1, nd*4H)
    out_ref: (nd, T, B, H)   per-direction output, lane-offset-0 stores
    pre_ref: (T, B, nd*4H)   VMEM scratch for the hoisted projection
    """
    nd, T, B, H = out_ref.shape
    G = 4 * H
    U = _unroll_factor(T)

    _input_projection(x_ref, wih_ref, b_ref, pre_ref)

    whh_f = whh_ref[0]                           # (H, 4H), loaded once
    zeros = jnp.zeros((B, H), jnp.float32)

    if nd == 1:
        def body(it, carry):
            h, c = carry
            for u in range(U):                   # manual unroll (static)
                t = it * U + u
                h, c = _lstm_cell(pre_ref[t], h, c, whh_f, H)
                out_ref[0, t] = h
            return (h, c)

        lax.fori_loop(0, T // U, body, (zeros, zeros))
    else:
        whh_r = whh_ref[1]

        def body(it, carry):
            h_f, c_f, h_r, c_r = carry
            for u in range(U):                   # manual unroll (static)
                t = it * U + u
                tr = T - 1 - t
                # Interleaved fwd/rev chains: two independent recurrences per
                # iteration so their MXU/EUP latencies overlap.
                pre_f = pre_ref[t]
                pre_r = pre_ref[tr]
                h_f, c_f = _lstm_cell(pre_f[:, 0:G], h_f, c_f, whh_f, H)
                h_r, c_r = _lstm_cell(pre_r[:, G:2 * G], h_r, c_r, whh_r, H)
                out_ref[0, t] = h_f
                out_ref[1, tr] = h_r
            return (h_f, c_f, h_r, c_r)

        lax.fori_loop(0, T // U, body, (zeros, zeros, zeros, zeros))


def bilstm_last_fused_kernel(x_ref, wih_ref, whh_ref, b_ref, fcw_ref, fcb_ref,
                             out_ref, pre_ref):
    """Last (bi)LSTM layer fused with sum-over-time and the final Linear.

    x_ref:   (nd_in, T*B, Din)
    wih_ref: (nd_in, Din, nd*4H)
    whh_ref: (nd, H, 4H)
    b_ref:   (1, nd*4H)
    fcw_ref: (nd, H, O)      fc weight, transposed and split per direction
    fcb_ref: (1, O)
    out_ref: (B, O)
    pre_ref: (T, B, nd*4H)   VMEM scratch
    """
    B, O = out_ref.shape
    nd, H, _ = whh_ref.shape
    G = 4 * H
    T = pre_ref.shape[0]
    U = _unroll_factor(T)

    _input_projection(x_ref, wih_ref, b_ref, pre_ref)

    whh_f = whh_ref[0]
    zeros = jnp.zeros((B, H), jnp.float32)

    if nd == 1:
        def body(it, carry):
            h, c, hs = carry
            for u in range(U):
                t = it * U + u
                h, c = _lstm_cell(pre_ref[t], h, c, whh_f, H)
                hs = hs + h                      # time-sum fused in recurrence
            return (h, c, hs)

        _, _, hsum = lax.fori_loop(0, T // U, body, (zeros, zeros, zeros))
        acc = jnp.dot(hsum, fcw_ref[0], preferred_element_type=jnp.float32)
    else:
        whh_r = whh_ref[1]

        def body(it, carry):
            h_f, c_f, hs_f, h_r, c_r, hs_r = carry
            for u in range(U):
                t = it * U + u
                tr = T - 1 - t
                pre_f = pre_ref[t]
                pre_r = pre_ref[tr]
                h_f, c_f = _lstm_cell(pre_f[:, 0:G], h_f, c_f, whh_f, H)
                h_r, c_r = _lstm_cell(pre_r[:, G:2 * G], h_r, c_r, whh_r, H)
                hs_f = hs_f + h_f
                hs_r = hs_r + h_r
            return (h_f, c_f, hs_f, h_r, c_r, hs_r)

        res = lax.fori_loop(0, T // U, body, (zeros,) * 6)
        hsum_f, hsum_r = res[2], res[5]
        # Per-direction fc slices: no in-kernel lane concat needed.
        acc = (jnp.dot(hsum_f, fcw_ref[0], preferred_element_type=jnp.float32)
               + jnp.dot(hsum_r, fcw_ref[1], preferred_element_type=jnp.float32))

    out_ref[...] = acc + fcb_ref[...]


# ----------------------------------------------------------------------------
# pallas_call wrappers (grid-less: whole layer fits VMEM at these sizes)
# ----------------------------------------------------------------------------
def bilstm_layer(x_dirs, w_ih, w_hh, b, *, T, B):
    nd, H, G4 = w_hh.shape
    return pl.pallas_call(
        bilstm_layer_kernel,
        out_shape=jax.ShapeDtypeStruct((nd, T, B, H), jnp.float32),
        scratch_shapes=[pltpu.VMEM((T, B, nd * G4), jnp.float32)],
        compiler_params=_COMPILER_PARAMS,
    )(x_dirs, w_ih, w_hh, b)


def bilstm_last_fused(x_dirs, w_ih, w_hh, b, fc_w, fc_b, *, T, B):
    nd, H, G4 = w_hh.shape
    O = fc_w.shape[-1]
    return pl.pallas_call(
        bilstm_last_fused_kernel,
        out_shape=jax.ShapeDtypeStruct((B, O), jnp.float32),
        scratch_shapes=[pltpu.VMEM((T, B, nd * G4), jnp.float32)],
        compiler_params=_COMPILER_PARAMS,
    )(x_dirs, w_ih, w_hh, b, fc_w, fc_b)


# ----------------------------------------------------------------------------
# Model: parameter init + forward (glue in plain JAX, hot path in Pallas)
# ----------------------------------------------------------------------------
def pad_sequences(seqs, maxlen):
    """Keras-style pad_sequences with padding='post', truncating='post'."""
    out = np.zeros((len(seqs), maxlen), dtype=np.int32)
    for i, s in enumerate(seqs):
        s = list(s)[:maxlen]
        out[i, :len(s)] = s
    return out


def init_params(key, input_size, hidden_size, num_layers, output_size,
                embedding_dim, bidirectional):
    nd = 2 if bidirectional else 1
    H = hidden_size
    params = {}

    key, k_emb = jax.random.split(key)
    # nn.Embedding default init: N(0, 1)
    params["embedding"] = jax.random.normal(
        k_emb, (input_size, embedding_dim), dtype=jnp.float32)

    k = 1.0 / math.sqrt(H)
    lstm = []
    for layer in range(num_layers):
        in_dim = embedding_dim if layer == 0 else H * nd
        nd_in = 1 if layer == 0 else nd
        key, k1, k2, k3, k4 = jax.random.split(key, 5)
        # Per output direction, stored transposed: [in_dim, 4H], gate order i,f,g,o
        w_ih = jax.random.uniform(k1, (nd, in_dim, 4 * H),
                                  minval=-k, maxval=k, dtype=jnp.float32)
        w_hh = jax.random.uniform(k2, (nd, H, 4 * H),
                                  minval=-k, maxval=k, dtype=jnp.float32)
        b_ih = jax.random.uniform(k3, (nd, 1, 4 * H),
                                  minval=-k, maxval=k, dtype=jnp.float32)
        b_hh = jax.random.uniform(k4, (nd, 1, 4 * H),
                                  minval=-k, maxval=k, dtype=jnp.float32)
        # Fuse directions along the gate axis -> (in_dim, nd*4H), then split
        # rows per INPUT direction (folds the bidirectional feature interleave
        # into the weight layout; fwd-half rows first, then rev-half rows).
        w_ih_fused = jnp.transpose(w_ih, (1, 0, 2)).reshape(in_dim, nd * 4 * H)
        w_ih_fused = w_ih_fused.reshape(nd_in, in_dim // nd_in, nd * 4 * H)
        b_fused = jnp.transpose(b_ih + b_hh, (1, 0, 2)).reshape(1, nd * 4 * H)
        lstm.append({"w_ih": w_ih_fused, "w_hh": w_hh, "b": b_fused})
    params["lstm"] = lstm

    fc_in = H * nd
    kf = 1.0 / math.sqrt(fc_in)
    key, k5, k6 = jax.random.split(key, 3)
    # fc weight stored transposed and split per direction: (nd, H, O)
    params["fc_w"] = jax.random.uniform(k5, (nd, H, output_size),
                                        minval=-kf, maxval=kf,
                                        dtype=jnp.float32)
    params["fc_b"] = jax.random.uniform(k6, (1, output_size),
                                        minval=-kf, maxval=kf,
                                        dtype=jnp.float32)
    return params


def _forward_from_ids(params, ids_t):
    """Device part of the forward. ids_t: (T, B) int32 token ids, time-major."""
    T, B = ids_t.shape
    # Embedding row-gather in plain JAX (ids were transposed on the host so
    # the embedded activations come out time-major directly).
    # TODO(synk): the gather is left to XLA; a Pallas DMA-gather only pays off
    # for much larger embedding tables.
    x = jnp.take(params["embedding"], ids_t, axis=0)          # (T, B, E)
    x_dirs = x.reshape(1, T * B, -1)                           # (1, T*B, E)

    n_layers = len(params["lstm"])
    out = None
    for layer in range(n_layers):
        lp = params["lstm"][layer]
        if layer < n_layers - 1:
            y = bilstm_layer(x_dirs, lp["w_ih"], lp["w_hh"], lp["b"],
                             T=T, B=B)                         # (nd, T, B, H)
            nd = y.shape[0]
            x_dirs = y.reshape(nd, T * B, -1)                  # free, contiguous
        else:
            # Last layer: LSTM + sum-over-time + fc, fully fused.
            out = bilstm_last_fused(x_dirs, lp["w_ih"], lp["w_hh"], lp["b"],
                                    params["fc_w"], params["fc_b"],
                                    T=T, B=B)                  # (B, O)
    return out


_forward_from_ids_jit = jax.jit(_forward_from_ids)


def lstm_embedded_forward(params, seqs, *, max_sequence_length):
    # pad_sequences(..., padding='post', truncating='post')  — host glue
    ids = pad_sequences(seqs, max_sequence_length)             # (B, T) np.int32
    ids_t = jnp.asarray(ids).T                                  # (T, B)
    return _forward_from_ids_jit(params, ids_t)


# ----------------------------------------------------------------------------
if __name__ == "__main__":
    # Small, forward-consistent hyperparameters
    input_size = 32            # vocab size
    hidden_size = 32
    num_layers = 2
    output_size = 4
    embedding_dim = 16
    max_sequence_length = 8
    bidirectional = True
    batch = 2

    key = jax.random.PRNGKey(0)
    key, k_p, k_s1, k_s2 = jax.random.split(key, 4)

    params = init_params(k_p, input_size, hidden_size, num_layers,
                         output_size, embedding_dim, bidirectional)

    # Variable-length integer sequences (post-padded / post-truncated)
    seq_a = np.array(jax.random.randint(k_s1, (5,), 0, input_size))
    seq_b = np.array(jax.random.randint(k_s2, (11,), 0, input_size))
    seqs = [seq_a.tolist(), seq_b.tolist()][:batch]

    out = lstm_embedded_forward(params, seqs,
                                max_sequence_length=max_sequence_length)
    out = jax.block_until_ready(out)

    assert out.shape == (batch, output_size)
    assert bool(jnp.all(jnp.isfinite(out)))
    print("KERNEL_OK")
</pallas_src>

<mosaic_0001>
module attributes {stable_mosaic.version = 11 : i64} {
  func.func @bilstm_layer_kernel(%arg0: memref<1x16x16xf32, #tpu.memory_space<vmem>>, %arg1: memref<1x16x256xf32, #tpu.memory_space<vmem>>, %arg2: memref<2x32x128xf32, #tpu.memory_space<vmem>>, %arg3: memref<1x256xf32, #tpu.memory_space<vmem>>, %arg4: memref<2x8x2x32xf32, #tpu.memory_space<vmem>>, %arg5: memref<8x2x256xf32, #tpu.memory_space<vmem>>) attributes {dimension_semantics = [], scalar_prefetch = 0 : i64, scratch_operands = 1 : i64, tpu.core_type = #tpu.core_type<tc>} {
    %c0 = arith.constant 0 : index
    %c0_0 = arith.constant 0 : index
    %c0_1 = arith.constant 0 : index
    %0 = vector.load %arg0[%c0, %c0_0, %c0_1] : memref<1x16x16xf32, #tpu.memory_space<vmem>>, vector<1x16x16xf32>
    %1 = vector.shape_cast %0 : vector<1x16x16xf32> to vector<16x16xf32>
    %2 = arith.truncf %1 : vector<16x16xf32> to vector<16x16xbf16>
    %c0_2 = arith.constant 0 : index
    %c0_3 = arith.constant 0 : index
    %c0_4 = arith.constant 0 : index
    %3 = vector.load %arg1[%c0_2, %c0_3, %c0_4] : memref<1x16x256xf32, #tpu.memory_space<vmem>>, vector<1x16x256xf32>
    %4 = vector.shape_cast %3 : vector<1x16x256xf32> to vector<16x256xf32>
    %5 = arith.truncf %4 : vector<16x256xf32> to vector<16x256xbf16>
    %cst = arith.constant dense<0.000000e+00> : vector<16x256xf32>
    %6 = tpu.matmul %2, %5, %cst {dimension_numbers = #tpu.dot_dimension_numbers<[1], [0], [0], [1], [0, 0, 1, 1], [], []>} : vector<16x16xbf16>, vector<16x256xbf16>, vector<16x256xf32> -> vector<16x256xf32>
    %c0_5 = arith.constant 0 : index
    %c0_6 = arith.constant 0 : index
    %7 = vector.load %arg3[%c0_5, %c0_6] : memref<1x256xf32, #tpu.memory_space<vmem>>, vector<1x256xf32>
    %8 = vector.broadcast %7 : vector<1x256xf32> to vector<16x256xf32>
    %9 = arith.addf %6, %8 : vector<16x256xf32>
    %10 = vector.extract_strided_slice %9 {offsets = [0, 0], sizes = [2, 256], strides = [1, 1]} : vector<16x256xf32> to vector<2x256xf32>
    %c0_7 = arith.constant 0 : index
    %c0_8 = arith.constant 0 : index
    %c0_9 = arith.constant 0 : index
    %11 = vector.load %arg5[%c0_7, %c0_8, %c0_9] : memref<8x2x256xf32, #tpu.memory_space<vmem>>, vector<1x2x256xf32>
    %12 = vector.shape_cast %11 : vector<1x2x256xf32> to vector<2x256xf32>
    %13 = vector.shape_cast %10 : vector<2x256xf32> to vector<1x2x256xf32>
    tpu.vector_store %arg5[%c0_7, %c0_8, %c0_9], %13 {strides = array<i32>} : memref<8x2x256xf32, #tpu.memory_space<vmem>>, vector<1x2x256xf32>,
    %14 = vector.extract_strided_slice %9 {offsets = [2, 0], sizes = [2, 256], strides = [1, 1]} : vector<16x256xf32> to vector<2x256xf32>
    %c1 = arith.constant 1 : index
    %c0_10 = arith.constant 0 : index
    %c0_11 = arith.constant 0 : index
    %15 = vector.load %arg5[%c1, %c0_10, %c0_11] : memref<8x2x256xf32, #tpu.memory_space<vmem>>, vector<1x2x256xf32>
    %16 = vector.shape_cast %15 : vector<1x2x256xf32> to vector<2x256xf32>
    %17 = vector.shape_cast %14 : vector<2x256xf32> to vector<1x2x256xf32>
    tpu.vector_store %arg5[%c1, %c0_10, %c0_11], %17 {strides = array<i32>} : memref<8x2x256xf32, #tpu.memory_space<vmem>>, vector<1x2x256xf32>,
    %18 = vector.extract_strided_slice %9 {offsets = [4, 0], sizes = [2, 256], strides = [1, 1]} : vector<16x256xf32> to vector<2x256xf32>
    %c2 = arith.constant 2 : index
    %c0_12 = arith.constant 0 : index
    %c0_13 = arith.constant 0 : index
    %19 = vector.load %arg5[%c2, %c0_12, %c0_13] : memref<8x2x256xf32, #tpu.memory_space<vmem>>, vector<1x2x256xf32>
    %20 = vector.shape_cast %19 : vector<1x2x256xf32> to vector<2x256xf32>
    %21 = vector.shape_cast %18 : vector<2x256xf32> to vector<1x2x256xf32>
    tpu.vector_store %arg5[%c2, %c0_12, %c0_13], %21 {strides = array<i32>} : memref<8x2x256xf32, #tpu.memory_space<vmem>>, vector<1x2x256xf32>,
    %22 = vector.extract_strided_slice %9 {offsets = [6, 0], sizes = [2, 256], strides = [1, 1]} : vector<16x256xf32> to vector<2x256xf32>
    %c3 = arith.constant 3 : index
    %c0_14 = arith.constant 0 : index
    %c0_15 = arith.constant 0 : index
    %23 = vector.load %arg5[%c3, %c0_14, %c0_15] : memref<8x2x256xf32, #tpu.memory_space<vmem>>, vector<1x2x256xf32>
    %24 = vector.shape_cast %23 : vector<1x2x256xf32> to vector<2x256xf32>
    %25 = vector.shape_cast %22 : vector<2x256xf32> to vector<1x2x256xf32>
    tpu.vector_store %arg5[%c3, %c0_14, %c0_15], %25 {strides = array<i32>} : memref<8x2x256xf32, #tpu.memory_space<vmem>>, vector<1x2x256xf32>,
    %26 = vector.extract_strided_slice %9 {offsets = [8, 0], sizes = [2, 256], strides = [1, 1]} : vector<16x256xf32> to vector<2x256xf32>
    %c4 = arith.constant 4 : index
    %c0_16 = arith.constant 0 : index
    %c0_17 = arith.constant 0 : index
    %27 = vector.load %arg5[%c4, %c0_16, %c0_17] : memref<8x2x256xf32, #tpu.memory_space<vmem>>, vector<1x2x256xf32>
    %28 = vector.shape_cast %27 : vector<1x2x256xf32> to vector<2x256xf32>
    %29 = vector.shape_cast %26 : vector<2x256xf32> to vector<1x2x256xf32>
    tpu.vector_store %arg5[%c4, %c0_16, %c0_17], %29 {strides = array<i32>} : memref<8x2x256xf32, #tpu.memory_space<vmem>>, vector<1x2x256xf32>,
    %30 = vector.extract_strided_slice %9 {offsets = [10, 0], sizes = [2, 256], strides = [1, 1]} : vector<16x256xf32> to vector<2x256xf32>
    %c5 = arith.constant 5 : index
    %c0_18 = arith.constant 0 : index
    %c0_19 = arith.constant 0 : index
    %31 = vector.load %arg5[%c5, %c0_18, %c0_19] : memref<8x2x256xf32, #tpu.memory_space<vmem>>, vector<1x2x256xf32>
    %32 = vector.shape_cast %31 : vector<1x2x256xf32> to vector<2x256xf32>
    %33 = vector.shape_cast %30 : vector<2x256xf32> to vector<1x2x256xf32>
    tpu.vector_store %arg5[%c5, %c0_18, %c0_19], %33 {strides = array<i32>} : memref<8x2x256xf32, #tpu.memory_space<vmem>>, vector<1x2x256xf32>,
    %34 = vector.extract_strided_slice %9 {offsets = [12, 0], sizes = [2, 256], strides = [1, 1]} : vector<16x256xf32> to vector<2x256xf32>
    %c6 = arith.constant 6 : index
    %c0_20 = arith.constant 0 : index
    %c0_21 = arith.constant 0 : index
    %35 = vector.load %arg5[%c6, %c0_20, %c0_21] : memref<8x2x256xf32, #tpu.memory_space<vmem>>, vector<1x2x256xf32>
    %36 = vector.shape_cast %35 : vector<1x2x256xf32> to vector<2x256xf32>
    %37 = vector.shape_cast %34 : vector<2x256xf32> to vector<1x2x256xf32>
    tpu.vector_store %arg5[%c6, %c0_20, %c0_21], %37 {strides = array<i32>} : memref<8x2x256xf32, #tpu.memory_space<vmem>>, vector<1x2x256xf32>,
    %38 = vector.extract_strided_slice %9 {offsets = [14, 0], sizes = [2, 256], strides = [1, 1]} : vector<16x256xf32> to vector<2x256xf32>
    %c7 = arith.constant 7 : index
    %c0_22 = arith.constant 0 : index
    %c0_23 = arith.constant 0 : index
    %39 = vector.load %arg5[%c7, %c0_22, %c0_23] : memref<8x2x256xf32, #tpu.memory_space<vmem>>, vector<1x2x256xf32>
    %40 = vector.shape_cast %39 : vector<1x2x256xf32> to vector<2x256xf32>
    %41 = vector.shape_cast %38 : vector<2x256xf32> to vector<1x2x256xf32>
    tpu.vector_store %arg5[%c7, %c0_22, %c0_23], %41 {strides = array<i32>} : memref<8x2x256xf32, #tpu.memory_space<vmem>>, vector<1x2x256xf32>,
    %c0_24 = arith.constant 0 : index
    %c0_25 = arith.constant 0 : index
    %c0_26 = arith.constant 0 : index
    %42 = vector.load %arg2[%c0_24, %c0_25, %c0_26] : memref<2x32x128xf32, #tpu.memory_space<vmem>>, vector<1x32x128xf32>
    %43 = vector.shape_cast %42 : vector<1x32x128xf32> to vector<32x128xf32>
    %cst_27 = arith.constant 0.000000e+00 : f32
    %44 = vector.broadcast %cst_27 : f32 to vector<2x32xf32>
    %c1_28 = arith.constant 1 : index
    %c0_29 = arith.constant 0 : index
    %c0_30 = arith.constant 0 : index
    %45 = vector.load %arg2[%c1_28, %c0_29, %c0_30] : memref<2x32x128xf32, #tpu.memory_space<vmem>>, vector<1x32x128xf32>
    %46 = vector.shape_cast %45 : vector<1x32x128xf32> to vector<32x128xf32>
    %c0_i32 = arith.constant 0 : i32
    %c2_i32 = arith.constant 2 : i32
    %47 = arith.addi %c0_i32, %c2_i32 : i32
    %c1_i32 = arith.constant 1 : i32
    %48:4 = scf.for %arg6 = %c0_i32 to %47 step %c1_i32 iter_args(%arg7 = %44, %arg8 = %44, %arg9 = %44, %arg10 = %44) -> (vector<2x32xf32>, vector<2x32xf32>, vector<2x32xf32>, vector<2x32xf32>)  : i32 {
      %c4_i32 = arith.constant 4 : i32
      %49 = arith.muli %arg6, %c4_i32 : i32
      %c0_i32_32 = arith.constant 0 : i32
      %50 = arith.addi %49, %c0_i32_32 : i32
      %c7_i32 = arith.constant 7 : i32
      %51 = arith.subi %c7_i32, %50 : i32
      %52 = arith.index_cast %50 : i32 to index
      %c0_33 = arith.constant 0 : index
      %c0_34 = arith.constant 0 : index
      %53 = vector.load %arg5[%52, %c0_33, %c0_34] : memref<8x2x256xf32, #tpu.memory_space<vmem>>, vector<1x2x256xf32>
      %54 = vector.shape_cast %53 : vector<1x2x256xf32> to vector<2x256xf32>
      %55 = arith.index_cast %51 : i32 to index
      %c0_35 = arith.constant 0 : index
      %c0_36 = arith.constant 0 : index
      %56 = vector.load %arg5[%55, %c0_35, %c0_36] : memref<8x2x256xf32, #tpu.memory_space<vmem>>, vector<1x2x256xf32>
      %57 = vector.shape_cast %56 : vector<1x2x256xf32> to vector<2x256xf32>
      %58 = vector.extract_strided_slice %54 {offsets = [0, 0], sizes = [2, 128], strides = [1, 1]} : vector<2x256xf32> to vector<2x128xf32>
      %cst_37 = arith.constant dense<0.000000e+00> : vector<2x128xf32>
      %59 = tpu.matmul %arg7, %43, %cst_37 {dimension_numbers = #tpu.dot_dimension_numbers<[1], [0], [0], [1], [0, 0, 1, 1], [], []>} : vector<2x32xf32>, vector<32x128xf32>, vector<2x128xf32> -> vector<2x128xf32>
      %60 = arith.addf %58, %59 : vector<2x128xf32>
      %61 = arith.negf %60 : vector<2x128xf32>
      %62 = math.exp %61 : vector<2x128xf32>
      %cst_38 = arith.constant 1.000000e+00 : f32
      %63 = vector.broadcast %cst_38 : f32 to vector<2x128xf32>
      %64 = arith.addf %63, %62 : vector<2x128xf32>
      %65 = arith.divf %63, %64 : vector<2x128xf32>
      %66 = math.tanh %60 : vector<2x128xf32>
      %67 = vector.extract_strided_slice %65 {offsets = [0, 32], sizes = [2, 32], strides = [1, 1]} : vector<2x128xf32> to vector<2x32xf32>
      %68 = arith.mulf %67, %arg8 : vector<2x32xf32>
      %69 = vector.extract_strided_slice %65 {offsets = [0, 0], sizes = [2, 32], strides = [1, 1]} : vector<2x128xf32> to vector<2x32xf32>
      %70 = vector.extract_strided_slice %66 {offsets = [0, 64], sizes = [2, 32], strides = [1, 1]} : vector<2x128xf32> to vector<2x32xf32>
      %71 = arith.mulf %69, %70 : vector<2x32xf32>
      %72 = arith.addf %68, %71 : vector<2x32xf32>
      %73 = vector.extract_strided_slice %65 {offsets = [0, 96], sizes = [2, 32], strides = [1, 1]} : vector<2x128xf32> to vector<2x32xf32>
      %74 = math.tanh %72 : vector<2x32xf32>
      %75 = arith.mulf %73, %74 : vector<2x32xf32>
      %76 = vector.extract_strided_slice %57 {offsets = [0, 128], sizes = [2, 128], strides = [1, 1]} : vector<2x256xf32> to vector<2x128xf32>
      %cst_39 = arith.constant dense<0.000000e+00> : vector<2x128xf32>
      %77 = tpu.matmul %arg9, %46, %cst_39 {dimension_numbers = #tpu.dot_dimension_numbers<[1], [0], [0], [1], [0, 0, 1, 1], [], []>} : vector<2x32xf32>, vector<32x128xf32>, vector<2x128xf32> -> vector<2x128xf32>
      %78 = arith.addf %76, %77 : vector<2x128xf32>
      %79 = arith.negf %78 : vector<2x128xf32>
      %80 = math.exp %79 : vector<2x128xf32>
      %cst_40 = arith.constant 1.000000e+00 : f32
      %81 = vector.broadcast %cst_40 : f32 to vector<2x128xf32>
      %82 = arith.addf %81, %80 : vector<2x128xf32>
      %83 = arith.divf %81, %82 : vector<2x128xf32>
      %84 = math.tanh %78 : vector<2x128xf32>
      %85 = vector.extract_strided_slice %83 {offsets = [0, 32], sizes = [2, 32], strides = [1, 1]} : vector<2x128xf32> to vector<2x32xf32>
      %86 = arith.mulf %85, %arg10 : vector<2x32xf32>
      %87 = vector.extract_strided_slice %83 {offsets = [0, 0], sizes = [2, 32], strides = [1, 1]} : vector<2x128xf32> to vector<2x32xf32>
      %88 = vector.extract_strided_slice %84 {offsets = [0, 64], sizes = [2, 32], strides = [1, 1]} : vector<2x128xf32> to vector<2x32xf32>
      %89 = arith.mulf %87, %88 : vector<2x32xf32>
      %90 = arith.addf %86, %89 : vector<2x32xf32>
      %91 = vector.extract_strided_slice %83 {offsets = [0, 96], sizes = [2, 32], strides = [1, 1]} : vector<2x128xf32> to vector<2x32xf32>
      %92 = math.tanh %90 : vector<2x32xf32>
      %93 = arith.mulf %91, %92 : vector<2x32xf32>
      %c0_41 = arith.constant 0 : index
      %94 = arith.index_cast %50 : i32 to index
      %c0_42 = arith.constant 0 : index
      %c0_43 = arith.constant 0 : index
      %95 = vector.load %arg4[%c0_41, %94, %c0_42, %c0_43] : memref<2x8x2x32xf32, #tpu.memory_space<vmem>>, vector<1x1x2x32xf32>
      %96 = vector.shape_cast %95 : vector<1x1x2x32xf32> to vector<2x32xf32>
      %97 = vector.shape_cast %75 : vector<2x32xf32> to vector<1x1x2x32xf32>
      tpu.vector_store %arg4[%c0_41, %94, %c0_42, %c0_43], %97 {strides = array<i32>} : memref<2x8x2x32xf32, #tpu.memory_space<vmem>>, vector<1x1x2x32xf32>,
      %c1_44 = arith.constant 1 : index
      %98 = arith.index_cast %51 : i32 to index
      %c0_45 = arith.constant 0 : index
      %c0_46 = arith.constant 0 : index
      %99 = vector.load %arg4[%c1_44, %98, %c0_45, %c0_46] : memref<2x8x2x32xf32, #tpu.memory_space<vmem>>, vector<1x1x2x32xf32>
      %100 = vector.shape_cast %99 : vector<1x1x2x32xf32> to vector<2x32xf32>
      %101 = vector.shape_cast %93 : vector<2x32xf32> to vector<1x1x2x32xf32>
      tpu.vector_store %arg4[%c1_44, %98, %c0_45, %c0_46], %101 {strides = array<i32>} : memref<2x8x2x32xf32, #tpu.memory_space<vmem>>, vector<1x1x2x32xf32>,
      %c4_i32_47 = arith.constant 4 : i32
      %102 = arith.muli %arg6, %c4_i32_47 : i32
      %c1_i32_48 = arith.constant 1 : i32
      %103 = arith.addi %102, %c1_i32_48 : i32
      %c7_i32_49 = arith.constant 7 : i32
      %104 = arith.subi %c7_i32_49, %103 : i32
      %105 = arith.index_cast %103 : i32 to index
      %c0_50 = arith.constant 0 : index
      %c0_51 = arith.constant 0 : index
      %106 = vector.load %arg5[%105, %c0_50, %c0_51] : memref<8x2x256xf32, #tpu.memory_space<vmem>>, vector<1x2x256xf32>
      %107 = vector.shape_cast %106 : vector<1x2x256xf32> to vector<2x256xf32>
      %108 = arith.index_cast %104 : i32 to index
      %c0_52 = arith.constant 0 : index
      %c0_53 = arith.constant 0 : index
      %109 = vector.load %arg5[%108, %c0_52, %c0_53] : memref<8x2x256xf32, #tpu.memory_space<vmem>>, vector<1x2x256xf32>
      %110 = vector.shape_cast %109 : vector<1x2x256xf32> to vector<2x256xf32>
      %111 = vector.extract_strided_slice %107 {offsets = [0, 0], sizes = [2, 128], strides = [1, 1]} : vector<2x256xf32> to vector<2x128xf32>
      %cst_54 = arith.constant dense<0.000000e+00> : vector<2x128xf32>
      %112 = tpu.matmul %75, %43, %cst_54 {dimension_numbers = #tpu.dot_dimension_numbers<[1], [0], [0], [1], [0, 0, 1, 1], [], []>} : vector<2x32xf32>, vector<32x128xf32>, vector<2x128xf32> -> vector<2x128xf32>
      %113 = arith.addf %111, %112 : vector<2x128xf32>
      %114 = arith.negf %113 : vector<2x128xf32>
      %115 = math.exp %114 : vector<2x128xf32>
      %cst_55 = arith.constant 1.000000e+00 : f32
      %116 = vector.broadcast %cst_55 : f32 to vector<2x128xf32>
      %117 = arith.addf %116, %115 : vector<2x128xf32>
      %118 = arith.divf %116, %117 : vector<2x128xf32>
      %119 = math.tanh %113 : vector<2x128xf32>
      %120 = vector.extract_strided_slice %118 {offsets = [0, 32], sizes = [2, 32], strides = [1, 1]} : vector<2x128xf32> to vector<2x32xf32>
      %121 = arith.mulf %120, %72 : vector<2x32xf32>
      %122 = vector.extract_strided_slice %118 {offsets = [0, 0], sizes = [2, 32], strides = [1, 1]} : vector<2x128xf32> to vector<2x32xf32>
      %123 = vector.extract_strided_slice %119 {offsets = [0, 64], sizes = [2, 32], strides = [1, 1]} : vector<2x128xf32> to vector<2x32xf32>
      %124 = arith.mulf %122, %123 : vector<2x32xf32>
      %125 = arith.addf %121, %124 : vector<2x32xf32>
      %126 = vector.extract_strided_slice %118 {offsets = [0, 96], sizes = [2, 32], strides = [1, 1]} : vector<2x128xf32> to vector<2x32xf32>
      %127 = math.tanh %125 : vector<2x32xf32>
      %128 = arith.mulf %126, %127 : vector<2x32xf32>
      %129 = vector.extract_strided_slice %110 {offsets = [0, 128], sizes = [2, 128], strides = [1, 1]} : vector<2x256xf32> to vector<2x128xf32>
      %cst_56 = arith.constant dense<0.000000e+00> : vector<2x128xf32>
      %130 = tpu.matmul %93, %46, %cst_56 {dimension_numbers = #tpu.dot_dimension_numbers<[1], [0], [0], [1], [0, 0, 1, 1], [], []>} : vector<2x32xf32>, vector<32x128xf32>, vector<2x128xf32> -> vector<2x128xf32>
      %131 = arith.addf %129, %130 : vector<2x128xf32>
      %132 = arith.negf %131 : vector<2x128xf32>
      %133 = math.exp %132 : vector<2x128xf32>
      %cst_57 = arith.constant 1.000000e+00 : f32
      %134 = vector.broadcast %cst_57 : f32 to vector<2x128xf32>
      %135 = arith.addf %134, %133 : vector<2x128xf32>
      %136 = arith.divf %134, %135 : vector<2x128xf32>
      %137 = math.tanh %131 : vector<2x128xf32>
      %138 = vector.extract_strided_slice %136 {offsets = [0, 32], sizes = [2, 32], strides = [1, 1]} : vector<2x128xf32> to vector<2x32xf32>
      %139 = arith.mulf %138, %90 : vector<2x32xf32>
      %140 = vector.extract_strided_slice %136 {offsets = [0, 0], sizes = [2, 32], strides = [1, 1]} : vector<2x128xf32> to vector<2x32xf32>
      %141 = vector.extract_strided_slice %137 {offsets = [0, 64], sizes = [2, 32], strides = [1, 1]} : vector<2x128xf32> to vector<2x32xf32>
      %142 = arith.mulf %140, %141 : vector<2x32xf32>
      %143 = arith.addf %139, %142 : vector<2x32xf32>
      %144 = vector.extract_strided_slice %136 {offsets = [0, 96], sizes = [2, 32], strides = [1, 1]} : vector<2x128xf32> to vector<2x32xf32>
      %145 = math.tanh %143 : vector<2x32xf32>
      %146 = arith.mulf %144, %145 : vector<2x32xf32>
      %c0_58 = arith.constant 0 : index
      %147 = arith.index_cast %103 : i32 to index
      %c0_59 = arith.constant 0 : index
      %c0_60 = arith.constant 0 : index
      %148 = vector.load %arg4[%c0_58, %147, %c0_59, %c0_60] : memref<2x8x2x32xf32, #tpu.memory_space<vmem>>, vector<1x1x2x32xf32>
      %149 = vector.shape_cast %148 : vector<1x1x2x32xf32> to vector<2x32xf32>
      %150 = vector.shape_cast %128 : vector<2x32xf32> to vector<1x1x2x32xf32>
      tpu.vector_store %arg4[%c0_58, %147, %c0_59, %c0_60], %150 {strides = array<i32>} : memref<2x8x2x32xf32, #tpu.memory_space<vmem>>, vector<1x1x2x32xf32>,
      %c1_61 = arith.constant 1 : index
      %151 = arith.index_cast %104 : i32 to index
      %c0_62 = arith.constant 0 : index
      %c0_63 = arith.constant 0 : index
      %152 = vector.load %arg4[%c1_61, %151, %c0_62, %c0_63] : memref<2x8x2x32xf32, #tpu.memory_space<vmem>>, vector<1x1x2x32xf32>
      %153 = vector.shape_cast %152 : vector<1x1x2x32xf32> to vector<2x32xf32>
      %154 = vector.shape_cast %146 : vector<2x32xf32> to vector<1x1x2x32xf32>
      tpu.vector_store %arg4[%c1_61, %151, %c0_62, %c0_63], %154 {strides = array<i32>} : memref<2x8x2x32xf32, #tpu.memory_space<vmem>>, vector<1x1x2x32xf32>,
      %c4_i32_64 = arith.constant 4 : i32
      %155 = arith.muli %arg6, %c4_i32_64 : i32
      %c2_i32_65 = arith.constant 2 : i32
      %156 = arith.addi %155, %c2_i32_65 : i32
      %c7_i32_66 = arith.constant 7 : i32
      %157 = arith.subi %c7_i32_66, %156 : i32
      %158 = arith.index_cast %156 : i32 to index
      %c0_67 = arith.constant 0 : index
      %c0_68 = arith.constant 0 : index
      %159 = vector.load %arg5[%158, %c0_67, %c0_68] : memref<8x2x256xf32, #tpu.memory_space<vmem>>, vector<1x2x256xf32>
      %160 = vector.shape_cast %159 : vector<1x2x256xf32> to vector<2x256xf32>
      %161 = arith.index_cast %157 : i32 to index
      %c0_69 = arith.constant 0 : index
      %c0_70 = arith.constant 0 : index
      %162 = vector.load %arg5[%161, %c0_69, %c0_70] : memref<8x2x256xf32, #tpu.memory_space<vmem>>, vector<1x2x256xf32>
      %163 = vector.shape_cast %162 : vector<1x2x256xf32> to vector<2x256xf32>
      %164 = vector.extract_strided_slice %160 {offsets = [0, 0], sizes = [2, 128], strides = [1, 1]} : vector<2x256xf32> to vector<2x128xf32>
      %cst_71 = arith.constant dense<0.000000e+00> : vector<2x128xf32>
      %165 = tpu.matmul %128, %43, %cst_71 {dimension_numbers = #tpu.dot_dimension_numbers<[1], [0], [0], [1], [0, 0, 1, 1], [], []>} : vector<2x32xf32>, vector<32x128xf32>, vector<2x128xf32> -> vector<2x128xf32>
      %166 = arith.addf %164, %165 : vector<2x128xf32>
      %167 = arith.negf %166 : vector<2x128xf32>
      %168 = math.exp %167 : vector<2x128xf32>
      %cst_72 = arith.constant 1.000000e+00 : f32
      %169 = vector.broadcast %cst_72 : f32 to vector<2x128xf32>
      %170 = arith.addf %169, %168 : vector<2x128xf32>
      %171 = arith.divf %169, %170 : vector<2x128xf32>
      %172 = math.tanh %166 : vector<2x128xf32>
      %173 = vector.extract_strided_slice %171 {offsets = [0, 32], sizes = [2, 32], strides = [1, 1]} : vector<2x128xf32> to vector<2x32xf32>
      %174 = arith.mulf %173, %125 : vector<2x32xf32>
      %175 = vector.extract_strided_slice %171 {offsets = [0, 0], sizes = [2, 32], strides = [1, 1]} : vector<2x128xf32> to vector<2x32xf32>
      %176 = vector.extract_strided_slice %172 {offsets = [0, 64], sizes = [2, 32], strides = [1, 1]} : vector<2x128xf32> to vector<2x32xf32>
      %177 = arith.mulf %175, %176 : vector<2x32xf32>
      %178 = arith.addf %174, %177 : vector<2x32xf32>
      %179 = vector.extract_strided_slice %171 {offsets = [0, 96], sizes = [2, 32], strides = [1, 1]} : vector<2x128xf32> to vector<2x32xf32>
      %180 = math.tanh %178 : vector<2x32xf32>
      %181 = arith.mulf %179, %180 : vector<2x32xf32>
      %182 = vector.extract_strided_slice %163 {offsets = [0, 128], sizes = [2, 128], strides = [1, 1]} : vector<2x256xf32> to vector<2x128xf32>
      %cst_73 = arith.constant dense<0.000000e+00> : vector<2x128xf32>
      %183 = tpu.matmul %146, %46, %cst_73 {dimension_numbers = #tpu.dot_dimension_numbers<[1], [0], [0], [1], [0, 0, 1, 1], [], []>} : vector<2x32xf32>, vector<32x128xf32>, vector<2x128xf32> -> vector<2x128xf32>
      %184 = arith.addf %182, %183 : vector<2x128xf32>
      %185 = arith.negf %184 : vector<2x128xf32>
      %186 = math.exp %185 : vector<2x128xf32>
      %cst_74 = arith.constant 1.000000e+00 : f32
      %187 = vector.broadcast %cst_74 : f32 to vector<2x128xf32>
      %188 = arith.addf %187, %186 : vector<2x128xf32>
      %189 = arith.divf %187, %188 : vector<2x128xf32>
      %190 = math.tanh %184 : vector<2x128xf32>
      %191 = vector.extract_strided_slice %189 {offsets = [0, 32], sizes = [2, 32], strides = [1, 1]} : vector<2x128xf32> to vector<2x32xf32>
      %192 = arith.mulf %191, %143 : vector<2x32xf32>
      %193 = vector.extract_strided_slice %189 {offsets = [0, 0], sizes = [2, 32], strides = [1, 1]} : vector<2x128xf32> to vector<2x32xf32>
      %194 = vector.extract_strided_slice %190 {offsets = [0, 64], sizes = [2, 32], strides = [1, 1]} : vector<2x128xf32> to vector<2x32xf32>
      %195 = arith.mulf %193, %194 : vector<2x32xf32>
      %196 = arith.addf %192, %195 : vector<2x32xf32>
      %197 = vector.extract_strided_slice %189 {offsets = [0, 96], sizes = [2, 32], strides = [1, 1]} : vector<2x128xf32> to vector<2x32xf32>
      %198 = math.tanh %196 : vector<2x32xf32>
      %199 = arith.mulf %197, %198 : vector<2x32xf32>
      %c0_75 = arith.constant 0 : index
      %200 = arith.index_cast %156 : i32 to index
      %c0_76 = arith.constant 0 : index
      %c0_77 = arith.constant 0 : index
      %201 = vector.load %arg4[%c0_75, %200, %c0_76, %c0_77] : memref<2x8x2x32xf32, #tpu.memory_space<vmem>>, vector<1x1x2x32xf32>
      %202 = vector.shape_cast %201 : vector<1x1x2x32xf32> to vector<2x32xf32>
      %203 = vector.shape_cast %181 : vector<2x32xf32> to vector<1x1x2x32xf32>
      tpu.vector_store %arg4[%c0_75, %200, %c0_76, %c0_77], %203 {strides = array<i32>} : memref<2x8x2x32xf32, #tpu.memory_space<vmem>>, vector<1x1x2x32xf32>,
      %c1_78 = arith.constant 1 : index
      %204 = arith.index_cast %157 : i32 to index
      %c0_79 = arith.constant 0 : index
      %c0_80 = arith.constant 0 : index
      %205 = vector.load %arg4[%c1_78, %204, %c0_79, %c0_80] : memref<2x8x2x32xf32, #tpu.memory_space<vmem>>, vector<1x1x2x32xf32>
      %206 = vector.shape_cast %205 : vector<1x1x2x32xf32> to vector<2x32xf32>
      %207 = vector.shape_cast %199 : vector<2x32xf32> to vector<1x1x2x32xf32>
      tpu.vector_store %arg4[%c1_78, %204, %c0_79, %c0_80], %207 {strides = array<i32>} : memref<2x8x2x32xf32, #tpu.memory_space<vmem>>, vector<1x1x2x32xf32>,
      %c4_i32_81 = arith.constant 4 : i32
      %208 = arith.muli %arg6, %c4_i32_81 : i32
      %c3_i32 = arith.constant 3 : i32
      %209 = arith.addi %208, %c3_i32 : i32
      %c7_i32_82 = arith.constant 7 : i32
      %210 = arith.subi %c7_i32_82, %209 : i32
      %211 = arith.index_cast %209 : i32 to index
      %c0_83 = arith.constant 0 : index
      %c0_84 = arith.constant 0 : index
      %212 = vector.load %arg5[%211, %c0_83, %c0_84] : memref<8x2x256xf32, #tpu.memory_space<vmem>>, vector<1x2x256xf32>
      %213 = vector.shape_cast %212 : vector<1x2x256xf32> to vector<2x256xf32>
      %214 = arith.index_cast %210 : i32 to index
      %c0_85 = arith.constant 0 : index
      %c0_86 = arith.constant 0 : index
      %215 = vector.load %arg5[%214, %c0_85, %c0_86] : memref<8x2x256xf32, #tpu.memory_space<vmem>>, vector<1x2x256xf32>
      %216 = vector.shape_cast %215 : vector<1x2x256xf32> to vector<2x256xf32>
      %217 = vector.extract_strided_slice %213 {offsets = [0, 0], sizes = [2, 128], strides = [1, 1]} : vector<2x256xf32> to vector<2x128xf32>
      %cst_87 = arith.constant dense<0.000000e+00> : vector<2x128xf32>
      %218 = tpu.matmul %181, %43, %cst_87 {dimension_numbers = #tpu.dot_dimension_numbers<[1], [0], [0], [1], [0, 0, 1, 1], [], []>} : vector<2x32xf32>, vector<32x128xf32>, vector<2x128xf32> -> vector<2x128xf32>
      %219 = arith.addf %217, %218 : vector<2x128xf32>
      %220 = arith.negf %219 : vector<2x128xf32>
      %221 = math.exp %220 : vector<2x128xf32>
      %cst_88 = arith.constant 1.000000e+00 : f32
      %222 = vector.broadcast %cst_88 : f32 to vector<2x128xf32>
      %223 = arith.addf %222, %221 : vector<2x128xf32>
      %224 = arith.divf %222, %223 : vector<2x128xf32>
      %225 = math.tanh %219 : vector<2x128xf32>
      %226 = vector.extract_strided_slice %224 {offsets = [0, 32], sizes = [2, 32], strides = [1, 1]} : vector<2x128xf32> to vector<2x32xf32>
      %227 = arith.mulf %226, %178 : vector<2x32xf32>
      %228 = vector.extract_strided_slice %224 {offsets = [0, 0], sizes = [2, 32], strides = [1, 1]} : vector<2x128xf32> to vector<2x32xf32>
      %229 = vector.extract_strided_slice %225 {offsets = [0, 64], sizes = [2, 32], strides = [1, 1]} : vector<2x128xf32> to vector<2x32xf32>
      %230 = arith.mulf %228, %229 : vector<2x32xf32>
      %231 = arith.addf %227, %230 : vector<2x32xf32>
      %232 = vector.extract_strided_slice %224 {offsets = [0, 96], sizes = [2, 32], strides = [1, 1]} : vector<2x128xf32> to vector<2x32xf32>
      %233 = math.tanh %231 : vector<2x32xf32>
      %234 = arith.mulf %232, %233 : vector<2x32xf32>
      %235 = vector.extract_strided_slice %216 {offsets = [0, 128], sizes = [2, 128], strides = [1, 1]} : vector<2x256xf32> to vector<2x128xf32>
      %cst_89 = arith.constant dense<0.000000e+00> : vector<2x128xf32>
      %236 = tpu.matmul %199, %46, %cst_89 {dimension_numbers = #tpu.dot_dimension_numbers<[1], [0], [0], [1], [0, 0, 1, 1], [], []>} : vector<2x32xf32>, vector<32x128xf32>, vector<2x128xf32> -> vector<2x128xf32>
      %237 = arith.addf %235, %236 : vector<2x128xf32>
      %238 = arith.negf %237 : vector<2x128xf32>
      %239 = math.exp %238 : vector<2x128xf32>
      %cst_90 = arith.constant 1.000000e+00 : f32
      %240 = vector.broadcast %cst_90 : f32 to vector<2x128xf32>
      %241 = arith.addf %240, %239 : vector<2x128xf32>
      %242 = arith.divf %240, %241 : vector<2x128xf32>
      %243 = math.tanh %237 : vector<2x128xf32>
      %244 = vector.extract_strided_slice %242 {offsets = [0, 32], sizes = [2, 32], strides = [1, 1]} : vector<2x128xf32> to vector<2x32xf32>
      %245 = arith.mulf %244, %196 : vector<2x32xf32>
      %246 = vector.extract_strided_slice %242 {offsets = [0, 0], sizes = [2, 32], strides = [1, 1]} : vector<2x128xf32> to vector<2x32xf32>
      %247 = vector.extract_strided_slice %243 {offsets = [0, 64], sizes = [2, 32], strides = [1, 1]} : vector<2x128xf32> to vector<2x32xf32>
      %248 = arith.mulf %246, %247 : vector<2x32xf32>
      %249 = arith.addf %245, %248 : vector<2x32xf32>
      %250 = vector.extract_strided_slice %242 {offsets = [0, 96], sizes = [2, 32], strides = [1, 1]} : vector<2x128xf32> to vector<2x32xf32>
      %251 = math.tanh %249 : vector<2x32xf32>
      %252 = arith.mulf %250, %251 : vector<2x32xf32>
      %c0_91 = arith.constant 0 : index
      %253 = arith.index_cast %209 : i32 to index
      %c0_92 = arith.constant 0 : index
      %c0_93 = arith.constant 0 : index
      %254 = vector.load %arg4[%c0_91, %253, %c0_92, %c0_93] : memref<2x8x2x32xf32, #tpu.memory_space<vmem>>, vector<1x1x2x32xf32>
      %255 = vector.shape_cast %254 : vector<1x1x2x32xf32> to vector<2x32xf32>
      %256 = vector.shape_cast %234 : vector<2x32xf32> to vector<1x1x2x32xf32>
      tpu.vector_store %arg4[%c0_91, %253, %c0_92, %c0_93], %256 {strides = array<i32>} : memref<2x8x2x32xf32, #tpu.memory_space<vmem>>, vector<1x1x2x32xf32>,
      %c1_94 = arith.constant 1 : index
      %257 = arith.index_cast %210 : i32 to index
      %c0_95 = arith.constant 0 : index
      %c0_96 = arith.constant 0 : index
      %258 = vector.load %arg4[%c1_94, %257, %c0_95, %c0_96] : memref<2x8x2x32xf32, #tpu.memory_space<vmem>>, vector<1x1x2x32xf32>
      %259 = vector.shape_cast %258 : vector<1x1x2x32xf32> to vector<2x32xf32>
      %260 = vector.shape_cast %252 : vector<2x32xf32> to vector<1x1x2x32xf32>
      tpu.vector_store %arg4[%c1_94, %257, %c0_95, %c0_96], %260 {strides = array<i32>} : memref<2x8x2x32xf32, #tpu.memory_space<vmem>>, vector<1x1x2x32xf32>,
      scf.yield %234, %231, %252, %249 : vector<2x32xf32>, vector<2x32xf32>, vector<2x32xf32>, vector<2x32xf32>
    }
    %c2_i32_31 = arith.constant 2 : i32
    return
  }
}

module attributes {stable_mosaic.version = 11 : i64} {
  func.func @bilstm_last_fused_kernel(%arg0: memref<2x16x32xf32, #tpu.memory_space<vmem>>, %arg1: memref<2x32x256xf32, #tpu.memory_space<vmem>>, %arg2: memref<2x32x128xf32, #tpu.memory_space<vmem>>, %arg3: memref<1x256xf32, #tpu.memory_space<vmem>>, %arg4: memref<2x32x4xf32, #tpu.memory_space<vmem>>, %arg5: memref<1x4xf32, #tpu.memory_space<vmem>>, %arg6: memref<2x4xf32, #tpu.memory_space<vmem>>, %arg7: memref<8x2x256xf32, #tpu.memory_space<vmem>>) attributes {dimension_semantics = [], scalar_prefetch = 0 : i64, scratch_operands = 1 : i64, tpu.core_type = #tpu.core_type<tc>} {
    %c0 = arith.constant 0 : index
    %c0_0 = arith.constant 0 : index
    %c0_1 = arith.constant 0 : index
    %0 = vector.load %arg0[%c0, %c0_0, %c0_1] : memref<2x16x32xf32, #tpu.memory_space<vmem>>, vector<1x16x32xf32>
    %1 = vector.shape_cast %0 : vector<1x16x32xf32> to vector<16x32xf32>
    %2 = arith.truncf %1 : vector<16x32xf32> to vector<16x32xbf16>
    %c0_2 = arith.constant 0 : index
    %c0_3 = arith.constant 0 : index
    %c0_4 = arith.constant 0 : index
    %3 = vector.load %arg1[%c0_2, %c0_3, %c0_4] : memref<2x32x256xf32, #tpu.memory_space<vmem>>, vector<1x32x256xf32>
    %4 = vector.shape_cast %3 : vector<1x32x256xf32> to vector<32x256xf32>
    %5 = arith.truncf %4 : vector<32x256xf32> to vector<32x256xbf16>
    %cst = arith.constant dense<0.000000e+00> : vector<16x256xf32>
    %6 = tpu.matmul %2, %5, %cst {dimension_numbers = #tpu.dot_dimension_numbers<[1], [0], [0], [1], [0, 0, 1, 1], [], []>} : vector<16x32xbf16>, vector<32x256xbf16>, vector<16x256xf32> -> vector<16x256xf32>
    %c1 = arith.constant 1 : index
    %c0_5 = arith.constant 0 : index
    %c0_6 = arith.constant 0 : index
    %7 = vector.load %arg0[%c1, %c0_5, %c0_6] : memref<2x16x32xf32, #tpu.memory_space<vmem>>, vector<1x16x32xf32>
    %8 = vector.shape_cast %7 : vector<1x16x32xf32> to vector<16x32xf32>
    %9 = arith.truncf %8 : vector<16x32xf32> to vector<16x32xbf16>
    %c1_7 = arith.constant 1 : index
    %c0_8 = arith.constant 0 : index
    %c0_9 = arith.constant 0 : index
    %10 = vector.load %arg1[%c1_7, %c0_8, %c0_9] : memref<2x32x256xf32, #tpu.memory_space<vmem>>, vector<1x32x256xf32>
    %11 = vector.shape_cast %10 : vector<1x32x256xf32> to vector<32x256xf32>
    %12 = arith.truncf %11 : vector<32x256xf32> to vector<32x256xbf16>
    %cst_10 = arith.constant dense<0.000000e+00> : vector<16x256xf32>
    %13 = tpu.matmul %9, %12, %cst_10 {dimension_numbers = #tpu.dot_dimension_numbers<[1], [0], [0], [1], [0, 0, 1, 1], [], []>} : vector<16x32xbf16>, vector<32x256xbf16>, vector<16x256xf32> -> vector<16x256xf32>
    %14 = arith.addf %6, %13 : vector<16x256xf32>
    %c0_11 = arith.constant 0 : index
    %c0_12 = arith.constant 0 : index
    %15 = vector.load %arg3[%c0_11, %c0_12] : memref<1x256xf32, #tpu.memory_space<vmem>>, vector<1x256xf32>
    %16 = vector.broadcast %15 : vector<1x256xf32> to vector<16x256xf32>
    %17 = arith.addf %14, %16 : vector<16x256xf32>
    %18 = vector.extract_strided_slice %17 {offsets = [0, 0], sizes = [2, 256], strides = [1, 1]} : vector<16x256xf32> to vector<2x256xf32>
    %c0_13 = arith.constant 0 : index
    %c0_14 = arith.constant 0 : index
    %c0_15 = arith.constant 0 : index
    %19 = vector.load %arg7[%c0_13, %c0_14, %c0_15] : memref<8x2x256xf32, #tpu.memory_space<vmem>>, vector<1x2x256xf32>
    %20 = vector.shape_cast %19 : vector<1x2x256xf32> to vector<2x256xf32>
    %21 = vector.shape_cast %18 : vector<2x256xf32> to vector<1x2x256xf32>
    tpu.vector_store %arg7[%c0_13, %c0_14, %c0_15], %21 {strides = array<i32>} : memref<8x2x256xf32, #tpu.memory_space<vmem>>, vector<1x2x256xf32>,
    %22 = vector.extract_strided_slice %17 {offsets = [2, 0], sizes = [2, 256], strides = [1, 1]} : vector<16x256xf32> to vector<2x256xf32>
    %c1_16 = arith.constant 1 : index
    %c0_17 = arith.constant 0 : index
    %c0_18 = arith.constant 0 : index
    %23 = vector.load %arg7[%c1_16, %c0_17, %c0_18] : memref<8x2x256xf32, #tpu.memory_space<vmem>>, vector<1x2x256xf32>
    %24 = vector.shape_cast %23 : vector<1x2x256xf32> to vector<2x256xf32>
    %25 = vector.shape_cast %22 : vector<2x256xf32> to vector<1x2x256xf32>
    tpu.vector_store %arg7[%c1_16, %c0_17, %c0_18], %25 {strides = array<i32>} : memref<8x2x256xf32, #tpu.memory_space<vmem>>, vector<1x2x256xf32>,
    %26 = vector.extract_strided_slice %17 {offsets = [4, 0], sizes = [2, 256], strides = [1, 1]} : vector<16x256xf32> to vector<2x256xf32>
    %c2 = arith.constant 2 : index
    %c0_19 = arith.constant 0 : index
    %c0_20 = arith.constant 0 : index
    %27 = vector.load %arg7[%c2, %c0_19, %c0_20] : memref<8x2x256xf32, #tpu.memory_space<vmem>>, vector<1x2x256xf32>
    %28 = vector.shape_cast %27 : vector<1x2x256xf32> to vector<2x256xf32>
    %29 = vector.shape_cast %26 : vector<2x256xf32> to vector<1x2x256xf32>
    tpu.vector_store %arg7[%c2, %c0_19, %c0_20], %29 {strides = array<i32>} : memref<8x2x256xf32, #tpu.memory_space<vmem>>, vector<1x2x256xf32>,
    %30 = vector.extract_strided_slice %17 {offsets = [6, 0], sizes = [2, 256], strides = [1, 1]} : vector<16x256xf32> to vector<2x256xf32>
    %c3 = arith.constant 3 : index
    %c0_21 = arith.constant 0 : index
    %c0_22 = arith.constant 0 : index
    %31 = vector.load %arg7[%c3, %c0_21, %c0_22] : memref<8x2x256xf32, #tpu.memory_space<vmem>>, vector<1x2x256xf32>
    %32 = vector.shape_cast %31 : vector<1x2x256xf32> to vector<2x256xf32>
    %33 = vector.shape_cast %30 : vector<2x256xf32> to vector<1x2x256xf32>
    tpu.vector_store %arg7[%c3, %c0_21, %c0_22], %33 {strides = array<i32>} : memref<8x2x256xf32, #tpu.memory_space<vmem>>, vector<1x2x256xf32>,
    %34 = vector.extract_strided_slice %17 {offsets = [8, 0], sizes = [2, 256], strides = [1, 1]} : vector<16x256xf32> to vector<2x256xf32>
    %c4 = arith.constant 4 : index
    %c0_23 = arith.constant 0 : index
    %c0_24 = arith.constant 0 : index
    %35 = vector.load %arg7[%c4, %c0_23, %c0_24] : memref<8x2x256xf32, #tpu.memory_space<vmem>>, vector<1x2x256xf32>
    %36 = vector.shape_cast %35 : vector<1x2x256xf32> to vector<2x256xf32>
    %37 = vector.shape_cast %34 : vector<2x256xf32> to vector<1x2x256xf32>
    tpu.vector_store %arg7[%c4, %c0_23, %c0_24], %37 {strides = array<i32>} : memref<8x2x256xf32, #tpu.memory_space<vmem>>, vector<1x2x256xf32>,
    %38 = vector.extract_strided_slice %17 {offsets = [10, 0], sizes = [2, 256], strides = [1, 1]} : vector<16x256xf32> to vector<2x256xf32>
    %c5 = arith.constant 5 : index
    %c0_25 = arith.constant 0 : index
    %c0_26 = arith.constant 0 : index
    %39 = vector.load %arg7[%c5, %c0_25, %c0_26] : memref<8x2x256xf32, #tpu.memory_space<vmem>>, vector<1x2x256xf32>
    %40 = vector.shape_cast %39 : vector<1x2x256xf32> to vector<2x256xf32>
    %41 = vector.shape_cast %38 : vector<2x256xf32> to vector<1x2x256xf32>
    tpu.vector_store %arg7[%c5, %c0_25, %c0_26], %41 {strides = array<i32>} : memref<8x2x256xf32, #tpu.memory_space<vmem>>, vector<1x2x256xf32>,
    %42 = vector.extract_strided_slice %17 {offsets = [12, 0], sizes = [2, 256], strides = [1, 1]} : vector<16x256xf32> to vector<2x256xf32>
    %c6 = arith.constant 6 : index
    %c0_27 = arith.constant 0 : index
    %c0_28 = arith.constant 0 : index
    %43 = vector.load %arg7[%c6, %c0_27, %c0_28] : memref<8x2x256xf32, #tpu.memory_space<vmem>>, vector<1x2x256xf32>
    %44 = vector.shape_cast %43 : vector<1x2x256xf32> to vector<2x256xf32>
    %45 = vector.shape_cast %42 : vector<2x256xf32> to vector<1x2x256xf32>
    tpu.vector_store %arg7[%c6, %c0_27, %c0_28], %45 {strides = array<i32>} : memref<8x2x256xf32, #tpu.memory_space<vmem>>, vector<1x2x256xf32>,
    %46 = vector.extract_strided_slice %17 {offsets = [14, 0], sizes = [2, 256], strides = [1, 1]} : vector<16x256xf32> to vector<2x256xf32>
    %c7 = arith.constant 7 : index
    %c0_29 = arith.constant 0 : index
    %c0_30 = arith.constant 0 : index
    %47 = vector.load %arg7[%c7, %c0_29, %c0_30] : memref<8x2x256xf32, #tpu.memory_space<vmem>>, vector<1x2x256xf32>
    %48 = vector.shape_cast %47 : vector<1x2x256xf32> to vector<2x256xf32>
    %49 = vector.shape_cast %46 : vector<2x256xf32> to vector<1x2x256xf32>
    tpu.vector_store %arg7[%c7, %c0_29, %c0_30], %49 {strides = array<i32>} : memref<8x2x256xf32, #tpu.memory_space<vmem>>, vector<1x2x256xf32>,
    %c0_31 = arith.constant 0 : index
    %c0_32 = arith.constant 0 : index
    %c0_33 = arith.constant 0 : index
    %50 = vector.load %arg2[%c0_31, %c0_32, %c0_33] : memref<2x32x128xf32, #tpu.memory_space<vmem>>, vector<1x32x128xf32>
    %51 = vector.shape_cast %50 : vector<1x32x128xf32> to vector<32x128xf32>
    %cst_34 = arith.constant 0.000000e+00 : f32
    %52 = vector.broadcast %cst_34 : f32 to vector<2x32xf32>
    %c1_35 = arith.constant 1 : index
    %c0_36 = arith.constant 0 : index
    %c0_37 = arith.constant 0 : index
    %53 = vector.load %arg2[%c1_35, %c0_36, %c0_37] : memref<2x32x128xf32, #tpu.memory_space<vmem>>, vector<1x32x128xf32>
    %54 = vector.shape_cast %53 : vector<1x32x128xf32> to vector<32x128xf32>
    %c0_i32 = arith.constant 0 : i32
    %c2_i32 = arith.constant 2 : i32
    %55 = arith.addi %c0_i32, %c2_i32 : i32
    %c1_i32 = arith.constant 1 : i32
    %56:6 = scf.for %arg8 = %c0_i32 to %55 step %c1_i32 iter_args(%arg9 = %52, %arg10 = %52, %arg11 = %52, %arg12 = %52, %arg13 = %52, %arg14 = %52) -> (vector<2x32xf32>, vector<2x32xf32>, vector<2x32xf32>, vector<2x32xf32>, vector<2x32xf32>, vector<2x32xf32>)  : i32 {
      %c4_i32 = arith.constant 4 : i32
      %68 = arith.muli %arg8, %c4_i32 : i32
      %c0_i32_51 = arith.constant 0 : i32
      %69 = arith.addi %68, %c0_i32_51 : i32
      %c7_i32 = arith.constant 7 : i32
      %70 = arith.subi %c7_i32, %69 : i32
      %71 = arith.index_cast %69 : i32 to index
      %c0_52 = arith.constant 0 : index
      %c0_53 = arith.constant 0 : index
      %72 = vector.load %arg7[%71, %c0_52, %c0_53] : memref<8x2x256xf32, #tpu.memory_space<vmem>>, vector<1x2x256xf32>
      %73 = vector.shape_cast %72 : vector<1x2x256xf32> to vector<2x256xf32>
      %74 = arith.index_cast %70 : i32 to index
      %c0_54 = arith.constant 0 : index
      %c0_55 = arith.constant 0 : index
      %75 = vector.load %arg7[%74, %c0_54, %c0_55] : memref<8x2x256xf32, #tpu.memory_space<vmem>>, vector<1x2x256xf32>
      %76 = vector.shape_cast %75 : vector<1x2x256xf32> to vector<2x256xf32>
      %77 = vector.extract_strided_slice %73 {offsets = [0, 0], sizes = [2, 128], strides = [1, 1]} : vector<2x256xf32> to vector<2x128xf32>
      %cst_56 = arith.constant dense<0.000000e+00> : vector<2x128xf32>
      %78 = tpu.matmul %arg9, %51, %cst_56 {dimension_numbers = #tpu.dot_dimension_numbers<[1], [0], [0], [1], [0, 0, 1, 1], [], []>} : vector<2x32xf32>, vector<32x128xf32>, vector<2x128xf32> -> vector<2x128xf32>
      %79 = arith.addf %77, %78 : vector<2x128xf32>
      %80 = arith.negf %79 : vector<2x128xf32>
      %81 = math.exp %80 : vector<2x128xf32>
      %cst_57 = arith.constant 1.000000e+00 : f32
      %82 = vector.broadcast %cst_57 : f32 to vector<2x128xf32>
      %83 = arith.addf %82, %81 : vector<2x128xf32>
      %84 = arith.divf %82, %83 : vector<2x128xf32>
      %85 = math.tanh %79 : vector<2x128xf32>
      %86 = vector.extract_strided_slice %84 {offsets = [0, 32], sizes = [2, 32], strides = [1, 1]} : vector<2x128xf32> to vector<2x32xf32>
      %87 = arith.mulf %86, %arg10 : vector<2x32xf32>
      %88 = vector.extract_strided_slice %84 {offsets = [0, 0], sizes = [2, 32], strides = [1, 1]} : vector<2x128xf32> to vector<2x32xf32>
      %89 = vector.extract_strided_slice %85 {offsets = [0, 64], sizes = [2, 32], strides = [1, 1]} : vector<2x128xf32> to vector<2x32xf32>
      %90 = arith.mulf %88, %89 : vector<2x32xf32>
      %91 = arith.addf %87, %90 : vector<2x32xf32>
      %92 = vector.extract_strided_slice %84 {offsets = [0, 96], sizes = [2, 32], strides = [1, 1]} : vector<2x128xf32> to vector<2x32xf32>
      %93 = math.tanh %91 : vector<2x32xf32>
      %94 = arith.mulf %92, %93 : vector<2x32xf32>
      %95 = vector.extract_strided_slice %76 {offsets = [0, 128], sizes = [2, 128], strides = [1, 1]} : vector<2x256xf32> to vector<2x128xf32>
      %cst_58 = arith.constant dense<0.000000e+00> : vector<2x128xf32>
      %96 = tpu.matmul %arg12, %54, %cst_58 {dimension_numbers = #tpu.dot_dimension_numbers<[1], [0], [0], [1], [0, 0, 1, 1], [], []>} : vector<2x32xf32>, vector<32x128xf32>, vector<2x128xf32> -> vector<2x128xf32>
      %97 = arith.addf %95, %96 : vector<2x128xf32>
      %98 = arith.negf %97 : vector<2x128xf32>
      %99 = math.exp %98 : vector<2x128xf32>
      %cst_59 = arith.constant 1.000000e+00 : f32
      %100 = vector.broadcast %cst_59 : f32 to vector<2x128xf32>
      %101 = arith.addf %100, %99 : vector<2x128xf32>
      %102 = arith.divf %100, %101 : vector<2x128xf32>
      %103 = math.tanh %97 : vector<2x128xf32>
      %104 = vector.extract_strided_slice %102 {offsets = [0, 32], sizes = [2, 32], strides = [1, 1]} : vector<2x128xf32> to vector<2x32xf32>
      %105 = arith.mulf %104, %arg13 : vector<2x32xf32>
      %106 = vector.extract_strided_slice %102 {offsets = [0, 0], sizes = [2, 32], strides = [1, 1]} : vector<2x128xf32> to vector<2x32xf32>
      %107 = vector.extract_strided_slice %103 {offsets = [0, 64], sizes = [2, 32], strides = [1, 1]} : vector<2x128xf32> to vector<2x32xf32>
      %108 = arith.mulf %106, %107 : vector<2x32xf32>
      %109 = arith.addf %105, %108 : vector<2x32xf32>
      %110 = vector.extract_strided_slice %102 {offsets = [0, 96], sizes = [2, 32], strides = [1, 1]} : vector<2x128xf32> to vector<2x32xf32>
      %111 = math.tanh %109 : vector<2x32xf32>
      %112 = arith.mulf %110, %111 : vector<2x32xf32>
      %113 = arith.addf %arg11, %94 : vector<2x32xf32>
      %114 = arith.addf %arg14, %112 : vector<2x32xf32>
      %c4_i32_60 = arith.constant 4 : i32
      %115 = arith.muli %arg8, %c4_i32_60 : i32
      %c1_i32_61 = arith.constant 1 : i32
      %116 = arith.addi %115, %c1_i32_61 : i32
      %c7_i32_62 = arith.constant 7 : i32
      %117 = arith.subi %c7_i32_62, %116 : i32
      %118 = arith.index_cast %116 : i32 to index
      %c0_63 = arith.constant 0 : index
      %c0_64 = arith.constant 0 : index
      %119 = vector.load %arg7[%118, %c0_63, %c0_64] : memref<8x2x256xf32, #tpu.memory_space<vmem>>, vector<1x2x256xf32>
      %120 = vector.shape_cast %119 : vector<1x2x256xf32> to vector<2x256xf32>
      %121 = arith.index_cast %117 : i32 to index
      %c0_65 = arith.constant 0 : index
      %c0_66 = arith.constant 0 : index
      %122 = vector.load %arg7[%121, %c0_65, %c0_66] : memref<8x2x256xf32, #tpu.memory_space<vmem>>, vector<1x2x256xf32>
      %123 = vector.shape_cast %122 : vector<1x2x256xf32> to vector<2x256xf32>
      %124 = vector.extract_strided_slice %120 {offsets = [0, 0], sizes = [2, 128], strides = [1, 1]} : vector<2x256xf32> to vector<2x128xf32>
      %cst_67 = arith.constant dense<0.000000e+00> : vector<2x128xf32>
      %125 = tpu.matmul %94, %51, %cst_67 {dimension_numbers = #tpu.dot_dimension_numbers<[1], [0], [0], [1], [0, 0, 1, 1], [], []>} : vector<2x32xf32>, vector<32x128xf32>, vector<2x128xf32> -> vector<2x128xf32>
      %126 = arith.addf %124, %125 : vector<2x128xf32>
      %127 = arith.negf %126 : vector<2x128xf32>
      %128 = math.exp %127 : vector<2x128xf32>
      %cst_68 = arith.constant 1.000000e+00 : f32
      %129 = vector.broadcast %cst_68 : f32 to vector<2x128xf32>
      %130 = arith.addf %129, %128 : vector<2x128xf32>
      %131 = arith.divf %129, %130 : vector<2x128xf32>
      %132 = math.tanh %126 : vector<2x128xf32>
      %133 = vector.extract_strided_slice %131 {offsets = [0, 32], sizes = [2, 32], strides = [1, 1]} : vector<2x128xf32> to vector<2x32xf32>
      %134 = arith.mulf %133, %91 : vector<2x32xf32>
      %135 = vector.extract_strided_slice %131 {offsets = [0, 0], sizes = [2, 32], strides = [1, 1]} : vector<2x128xf32> to vector<2x32xf32>
      %136 = vector.extract_strided_slice %132 {offsets = [0, 64], sizes = [2, 32], strides = [1, 1]} : vector<2x128xf32> to vector<2x32xf32>
      %137 = arith.mulf %135, %136 : vector<2x32xf32>
      %138 = arith.addf %134, %137 : vector<2x32xf32>
      %139 = vector.extract_strided_slice %131 {offsets = [0, 96], sizes = [2, 32], strides = [1, 1]} : vector<2x128xf32> to vector<2x32xf32>
      %140 = math.tanh %138 : vector<2x32xf32>
      %141 = arith.mulf %139, %140 : vector<2x32xf32>
      %142 = vector.extract_strided_slice %123 {offsets = [0, 128], sizes = [2, 128], strides = [1, 1]} : vector<2x256xf32> to vector<2x128xf32>
      %cst_69 = arith.constant dense<0.000000e+00> : vector<2x128xf32>
      %143 = tpu.matmul %112, %54, %cst_69 {dimension_numbers = #tpu.dot_dimension_numbers<[1], [0], [0], [1], [0, 0, 1, 1], [], []>} : vector<2x32xf32>, vector<32x128xf32>, vector<2x128xf32> -> vector<2x128xf32>
      %144 = arith.addf %142, %143 : vector<2x128xf32>
      %145 = arith.negf %144 : vector<2x128xf32>
      %146 = math.exp %145 : vector<2x128xf32>
      %cst_70 = arith.constant 1.000000e+00 : f32
      %147 = vector.broadcast %cst_70 : f32 to vector<2x128xf32>
      %148 = arith.addf %147, %146 : vector<2x128xf32>
      %149 = arith.divf %147, %148 : vector<2x128xf32>
      %150 = math.tanh %144 : vector<2x128xf32>
      %151 = vector.extract_strided_slice %149 {offsets = [0, 32], sizes = [2, 32], strides = [1, 1]} : vector<2x128xf32> to vector<2x32xf32>
      %152 = arith.mulf %151, %109 : vector<2x32xf32>
      %153 = vector.extract_strided_slice %149 {offsets = [0, 0], sizes = [2, 32], strides = [1, 1]} : vector<2x128xf32> to vector<2x32xf32>
      %154 = vector.extract_strided_slice %150 {offsets = [0, 64], sizes = [2, 32], strides = [1, 1]} : vector<2x128xf32> to vector<2x32xf32>
      %155 = arith.mulf %153, %154 : vector<2x32xf32>
      %156 = arith.addf %152, %155 : vector<2x32xf32>
      %157 = vector.extract_strided_slice %149 {offsets = [0, 96], sizes = [2, 32], strides = [1, 1]} : vector<2x128xf32> to vector<2x32xf32>
      %158 = math.tanh %156 : vector<2x32xf32>
      %159 = arith.mulf %157, %158 : vector<2x32xf32>
      %160 = arith.addf %113, %141 : vector<2x32xf32>
      %161 = arith.addf %114, %159 : vector<2x32xf32>
      %c4_i32_71 = arith.constant 4 : i32
      %162 = arith.muli %arg8, %c4_i32_71 : i32
      %c2_i32_72 = arith.constant 2 : i32
      %163 = arith.addi %162, %c2_i32_72 : i32
      %c7_i32_73 = arith.constant 7 : i32
      %164 = arith.subi %c7_i32_73, %163 : i32
      %165 = arith.index_cast %163 : i32 to index
      %c0_74 = arith.constant 0 : index
      %c0_75 = arith.constant 0 : index
      %166 = vector.load %arg7[%165, %c0_74, %c0_75] : memref<8x2x256xf32, #tpu.memory_space<vmem>>, vector<1x2x256xf32>
      %167 = vector.shape_cast %166 : vector<1x2x256xf32> to vector<2x256xf32>
      %168 = arith.index_cast %164 : i32 to index
      %c0_76 = arith.constant 0 : index
      %c0_77 = arith.constant 0 : index
      %169 = vector.load %arg7[%168, %c0_76, %c0_77] : memref<8x2x256xf32, #tpu.memory_space<vmem>>, vector<1x2x256xf32>
      %170 = vector.shape_cast %169 : vector<1x2x256xf32> to vector<2x256xf32>
      %171 = vector.extract_strided_slice %167 {offsets = [0, 0], sizes = [2, 128], strides = [1, 1]} : vector<2x256xf32> to vector<2x128xf32>
      %cst_78 = arith.constant dense<0.000000e+00> : vector<2x128xf32>
      %172 = tpu.matmul %141, %51, %cst_78 {dimension_numbers = #tpu.dot_dimension_numbers<[1], [0], [0], [1], [0, 0, 1, 1], [], []>} : vector<2x32xf32>, vector<32x128xf32>, vector<2x128xf32> -> vector<2x128xf32>
      %173 = arith.addf %171, %172 : vector<2x128xf32>
      %174 = arith.negf %173 : vector<2x128xf32>
      %175 = math.exp %174 : vector<2x128xf32>
      %cst_79 = arith.constant 1.000000e+00 : f32
      %176 = vector.broadcast %cst_79 : f32 to vector<2x128xf32>
      %177 = arith.addf %176, %175 : vector<2x128xf32>
      %178 = arith.divf %176, %177 : vector<2x128xf32>
      %179 = math.tanh %173 : vector<2x128xf32>
      %180 = vector.extract_strided_slice %178 {offsets = [0, 32], sizes = [2, 32], strides = [1, 1]} : vector<2x128xf32> to vector<2x32xf32>
      %181 = arith.mulf %180, %138 : vector<2x32xf32>
      %182 = vector.extract_strided_slice %178 {offsets = [0, 0], sizes = [2, 32], strides = [1, 1]} : vector<2x128xf32> to vector<2x32xf32>
      %183 = vector.extract_strided_slice %179 {offsets = [0, 64], sizes = [2, 32], strides = [1, 1]} : vector<2x128xf32> to vector<2x32xf32>
      %184 = arith.mulf %182, %183 : vector<2x32xf32>
      %185 = arith.addf %181, %184 : vector<2x32xf32>
      %186 = vector.extract_strided_slice %178 {offsets = [0, 96], sizes = [2, 32], strides = [1, 1]} : vector<2x128xf32> to vector<2x32xf32>
      %187 = math.tanh %185 : vector<2x32xf32>
      %188 = arith.mulf %186, %187 : vector<2x32xf32>
      %189 = vector.extract_strided_slice %170 {offsets = [0, 128], sizes = [2, 128], strides = [1, 1]} : vector<2x256xf32> to vector<2x128xf32>
      %cst_80 = arith.constant dense<0.000000e+00> : vector<2x128xf32>
      %190 = tpu.matmul %159, %54, %cst_80 {dimension_numbers = #tpu.dot_dimension_numbers<[1], [0], [0], [1], [0, 0, 1, 1], [], []>} : vector<2x32xf32>, vector<32x128xf32>, vector<2x128xf32> -> vector<2x128xf32>
      %191 = arith.addf %189, %190 : vector<2x128xf32>
      %192 = arith.negf %191 : vector<2x128xf32>
      %193 = math.exp %192 : vector<2x128xf32>
      %cst_81 = arith.constant 1.000000e+00 : f32
      %194 = vector.broadcast %cst_81 : f32 to vector<2x128xf32>
      %195 = arith.addf %194, %193 : vector<2x128xf32>
      %196 = arith.divf %194, %195 : vector<2x128xf32>
      %197 = math.tanh %191 : vector<2x128xf32>
      %198 = vector.extract_strided_slice %196 {offsets = [0, 32], sizes = [2, 32], strides = [1, 1]} : vector<2x128xf32> to vector<2x32xf32>
      %199 = arith.mulf %198, %156 : vector<2x32xf32>
      %200 = vector.extract_strided_slice %196 {offsets = [0, 0], sizes = [2, 32], strides = [1, 1]} : vector<2x128xf32> to vector<2x32xf32>
      %201 = vector.extract_strided_slice %197 {offsets = [0, 64], sizes = [2, 32], strides = [1, 1]} : vector<2x128xf32> to vector<2x32xf32>
      %202 = arith.mulf %200, %201 : vector<2x32xf32>
      %203 = arith.addf %199, %202 : vector<2x32xf32>
      %204 = vector.extract_strided_slice %196 {offsets = [0, 96], sizes = [2, 32], strides = [1, 1]} : vector<2x128xf32> to vector<2x32xf32>
      %205 = math.tanh %203 : vector<2x32xf32>
      %206 = arith.mulf %204, %205 : vector<2x32xf32>
      %207 = arith.addf %160, %188 : vector<2x32xf32>
      %208 = arith.addf %161, %206 : vector<2x32xf32>
      %c4_i32_82 = arith.constant 4 : i32
      %209 = arith.muli %arg8, %c4_i32_82 : i32
      %c3_i32 = arith.constant 3 : i32
      %210 = arith.addi %209, %c3_i32 : i32
      %c7_i32_83 = arith.constant 7 : i32
      %211 = arith.subi %c7_i32_83, %210 : i32
      %212 = arith.index_cast %210 : i32 to index
      %c0_84 = arith.constant 0 : index
      %c0_85 = arith.constant 0 : index
      %213 = vector.load %arg7[%212, %c0_84, %c0_85] : memref<8x2x256xf32, #tpu.memory_space<vmem>>, vector<1x2x256xf32>
      %214 = vector.shape_cast %213 : vector<1x2x256xf32> to vector<2x256xf32>
      %215 = arith.index_cast %211 : i32 to index
      %c0_86 = arith.constant 0 : index
      %c0_87 = arith.constant 0 : index
      %216 = vector.load %arg7[%215, %c0_86, %c0_87] : memref<8x2x256xf32, #tpu.memory_space<vmem>>, vector<1x2x256xf32>
      %217 = vector.shape_cast %216 : vector<1x2x256xf32> to vector<2x256xf32>
      %218 = vector.extract_strided_slice %214 {offsets = [0, 0], sizes = [2, 128], strides = [1, 1]} : vector<2x256xf32> to vector<2x128xf32>
      %cst_88 = arith.constant dense<0.000000e+00> : vector<2x128xf32>
      %219 = tpu.matmul %188, %51, %cst_88 {dimension_numbers = #tpu.dot_dimension_numbers<[1], [0], [0], [1], [0, 0, 1, 1], [], []>} : vector<2x32xf32>, vector<32x128xf32>, vector<2x128xf32> -> vector<2x128xf32>
      %220 = arith.addf %218, %219 : vector<2x128xf32>
      %221 = arith.negf %220 : vector<2x128xf32>
      %222 = math.exp %221 : vector<2x128xf32>
      %cst_89 = arith.constant 1.000000e+00 : f32
      %223 = vector.broadcast %cst_89 : f32 to vector<2x128xf32>
      %224 = arith.addf %223, %222 : vector<2x128xf32>
      %225 = arith.divf %223, %224 : vector<2x128xf32>
      %226 = math.tanh %220 : vector<2x128xf32>
      %227 = vector.extract_strided_slice %225 {offsets = [0, 32], sizes = [2, 32], strides = [1, 1]} : vector<2x128xf32> to vector<2x32xf32>
      %228 = arith.mulf %227, %185 : vector<2x32xf32>
      %229 = vector.extract_strided_slice %225 {offsets = [0, 0], sizes = [2, 32], strides = [1, 1]} : vector<2x128xf32> to vector<2x32xf32>
      %230 = vector.extract_strided_slice %226 {offsets = [0, 64], sizes = [2, 32], strides = [1, 1]} : vector<2x128xf32> to vector<2x32xf32>
      %231 = arith.mulf %229, %230 : vector<2x32xf32>
      %232 = arith.addf %228, %231 : vector<2x32xf32>
      %233 = vector.extract_strided_slice %225 {offsets = [0, 96], sizes = [2, 32], strides = [1, 1]} : vector<2x128xf32> to vector<2x32xf32>
      %234 = math.tanh %232 : vector<2x32xf32>
      %235 = arith.mulf %233, %234 : vector<2x32xf32>
      %236 = vector.extract_strided_slice %217 {offsets = [0, 128], sizes = [2, 128], strides = [1, 1]} : vector<2x256xf32> to vector<2x128xf32>
      %cst_90 = arith.constant dense<0.000000e+00> : vector<2x128xf32>
      %237 = tpu.matmul %206, %54, %cst_90 {dimension_numbers = #tpu.dot_dimension_numbers<[1], [0], [0], [1], [0, 0, 1, 1], [], []>} : vector<2x32xf32>, vector<32x128xf32>, vector<2x128xf32> -> vector<2x128xf32>
      %238 = arith.addf %236, %237 : vector<2x128xf32>
      %239 = arith.negf %238 : vector<2x128xf32>
      %240 = math.exp %239 : vector<2x128xf32>
      %cst_91 = arith.constant 1.000000e+00 : f32
      %241 = vector.broadcast %cst_91 : f32 to vector<2x128xf32>
      %242 = arith.addf %241, %240 : vector<2x128xf32>
      %243 = arith.divf %241, %242 : vector<2x128xf32>
      %244 = math.tanh %238 : vector<2x128xf32>
      %245 = vector.extract_strided_slice %243 {offsets = [0, 32], sizes = [2, 32], strides = [1, 1]} : vector<2x128xf32> to vector<2x32xf32>
      %246 = arith.mulf %245, %203 : vector<2x32xf32>
      %247 = vector.extract_strided_slice %243 {offsets = [0, 0], sizes = [2, 32], strides = [1, 1]} : vector<2x128xf32> to vector<2x32xf32>
      %248 = vector.extract_strided_slice %244 {offsets = [0, 64], sizes = [2, 32], strides = [1, 1]} : vector<2x128xf32> to vector<2x32xf32>
      %249 = arith.mulf %247, %248 : vector<2x32xf32>
      %250 = arith.addf %246, %249 : vector<2x32xf32>
      %251 = vector.extract_strided_slice %243 {offsets = [0, 96], sizes = [2, 32], strides = [1, 1]} : vector<2x128xf32> to vector<2x32xf32>
      %252 = math.tanh %250 : vector<2x32xf32>
      %253 = arith.mulf %251, %252 : vector<2x32xf32>
      %254 = arith.addf %207, %235 : vector<2x32xf32>
      %255 = arith.addf %208, %253 : vector<2x32xf32>
      scf.yield %235, %232, %254, %253, %250, %255 : vector<2x32xf32>, vector<2x32xf32>, vector<2x32xf32>, vector<2x32xf32>, vector<2x32xf32>, vector<2x32xf32>
    }
    %c2_i32_38 = arith.constant 2 : i32
    %c0_39 = arith.constant 0 : index
    %c0_40 = arith.constant 0 : index
    %c0_41 = arith.constant 0 : index
    %57 = vector.load %arg4[%c0_39, %c0_40, %c0_41] : memref<2x32x4xf32, #tpu.memory_space<vmem>>, vector<1x32x4xf32>
    %58 = vector.shape_cast %57 : vector<1x32x4xf32> to vector<32x4xf32>
    %cst_42 = arith.constant dense<0.000000e+00> : vector<2x4xf32>
    %59 = tpu.matmul %56#2, %58, %cst_42 {dimension_numbers = #tpu.dot_dimension_numbers<[1], [0], [0], [1], [0, 0, 1, 1], [], []>} : vector<2x32xf32>, vector<32x4xf32>, vector<2x4xf32> -> vector<2x4xf32>
    %c1_43 = arith.constant 1 : index
    %c0_44 = arith.constant 0 : index
    %c0_45 = arith.constant 0 : index
    %60 = vector.load %arg4[%c1_43, %c0_44, %c0_45] : memref<2x32x4xf32, #tpu.memory_space<vmem>>, vector<1x32x4xf32>
    %61 = vector.shape_cast %60 : vector<1x32x4xf32> to vector<32x4xf32>
    %cst_46 = arith.constant dense<0.000000e+00> : vector<2x4xf32>
    %62 = tpu.matmul %56#5, %61, %cst_46 {dimension_numbers = #tpu.dot_dimension_numbers<[1], [0], [0], [1], [0, 0, 1, 1], [], []>} : vector<2x32xf32>, vector<32x4xf32>, vector<2x4xf32> -> vector<2x4xf32>
    %63 = arith.addf %59, %62 : vector<2x4xf32>
    %c0_47 = arith.constant 0 : index
    %c0_48 = arith.constant 0 : index
    %64 = vector.load %arg5[%c0_47, %c0_48] : memref<1x4xf32, #tpu.memory_space<vmem>>, vector<1x4xf32>
    %65 = vector.broadcast %64 : vector<1x4xf32> to vector<2x4xf32>
    %66 = arith.addf %63, %65 : vector<2x4xf32>
    %c0_49 = arith.constant 0 : index
    %c0_50 = arith.constant 0 : index
    %67 = vector.load %arg6[%c0_49, %c0_50] : memref<2x4xf32, #tpu.memory_space<vmem>>, vector<2x4xf32>
    tpu.vector_store %arg6[%c0_49, %c0_50], %66 {strides = array<i32>} : memref<2x4xf32, #tpu.memory_space<vmem>>, vector<2x4xf32>,
    return
  }
}

</mosaic_0001>

<bundles_post_ra>
// kernel: _forward_from_ids.2
= control target key start
LH: loop header
LB: loop body
LE: loop exit
PB: predicated region body
PF: predicated region fallthrough
CT: control target
= control target key end

     0   :  { %v1596_v3 = vmov 0   ;;  %vm39_vm0 = vcmask 130048   ;;  %v29_v18 = vlaneseq  ;;  %v1597_v23 = vmov 1983009808   ;;  %s1921_s1 = inlined_call_operand.vmem [shape: f32[1,16,256], index: 1, kind: input, shape index: {}]   ;;  %s1922_s4 = inlined_call_operand.vmem [shape: f32[2,8,2,32], index: 4, kind: output, shape index: {}]   ;;  %s1923_s0 = inlined_call_operand.vmem [shape: f32[1,16,16], index: 0, kind: input, shape index: {}]   ;;  %s1924_s2 = inlined_call_operand.vmem [shape: f32[2,32,128], index: 2, kind: input, shape index: {}]   ;;  %s1925_s3 = inlined_call_operand.vmem [shape: f32[1,256], index: 3, kind: input, shape index: {}]  }
   0x1   :  { %v22_v0 = vld [vmem:[%s1921_s1 + $0x8] sm:$0xff]  ;;  %v24_v1 = vld [vmem:[%s1921_s1 + $0x18] sm:$0xff]  ;;  %v21_v2 = vld [vmem:[%s1921_s1] sm:$0xff]  ;;  %75 = vmatprep.mubr.bf16.mxu0 %v1596_v3  ;;  %v90_v24 = vunpack.c.l.s4 %v1597_v23  ;;  %v1695_v49 = vmov 0.0   ;;  %v1697_v50 = vmov 0.0   ;;  %v1699_v51 = vmov 0.0  }
   0x2   :  { %v26_v4 = vpack.c.bf16 %v24_v1, %v22_v0  ;;  %v23_v5 = vld [vmem:[%s1921_s1 + $0x10] sm:$0xff]  ;;  %v18_v6 = vld [vmem:[%s1923_s0] sm:$0xff]  ;;  %v19_v7 = vld [vmem:[%s1923_s0 + $0x8] sm:$0xff]  ;;  %v30_v19 = vshrl.u32 %v29_v18, 7  ;;  %v1701_v52 = vmov 0.0  }
   0x3   :  { %v25_v8 = vpack.c.bf16 %v23_v5, %v21_v2  ;;  %v20_v9 = vpack.c.bf16 %v19_v7, %v18_v6  ;;  %v1649_v10 = vld [vmem:[%s1924_s2] sm:$0xff]  ;;  %v1654_v11 = vld [vmem:[%s1924_s2 + $0x8] sm:$0xff]  ;;  %v1659_v12 = vld [vmem:[%s1924_s2 + $0x10] sm:$0xff]  ;;  %v91_v27 = vunpack.c.0.s8 %v90_v24 }
   0x4   :  { %43 = vmatprep.subr.bf16.mxu0 %v26_v4  ;;  %v1664_v13 = vld [vmem:[%s1924_s2 + $0x18] sm:$0xff]  ;;  %v1669_v14 = vld [vmem:[%s1924_s2 + $0x20] sm:$0xff]  ;;  %v1674_v15 = vld [vmem:[%s1924_s2 + $0x28] sm:$0xff]  ;;  %v31_v20 = vsub.s32 0, %v30_v19  ;;  %v35_v22 = vsub.s32 1, %v30_v19 }
   0x5   :  { %44 = vmatpush1.bf16.msra.mxu0 %v25_v8  ;;  %v1679_v16 = vld [vmem:[%s1924_s2 + $0x30] sm:$0xff]  ;;  %v1684_v17 = vld [vmem:[%s1924_s2 + $0x38] sm:$0xff]  ;;  %v27_v21 = vld [vmem:[%s1925_s3] sm:$0x3]  ;;  %v1689_v32 = vsub.s32 %v91_v27, %v30_v19  ;;  %s1703_s2 = smov 0  }
   0x6   :  { %v32_v25 = vrot.slane %v27_v21, %v31_v20  ;;  %v36_v26 = vrot.slane %v27_v21, %v35_v22 }
   0x8   :  { %1195 = vmatmul.mubr.msk.bf16.vlgmr.msra.gmra.mrb[0].mxu0 %vm39_vm0, %v20_v9 }
  0xdb   :  { %v77_v28 = vpop.f32.mrb[0].mxu0 }
  0xdc   :  { %v78_v29 = vadd.f32 %v77_v28, %v32_v25  ;;  %v79_v30 = vpop.f32.mrb[1].mxu0 }
  0xdd   :  { %v80_v31 = vadd.f32 %v79_v30, %v36_v26  ;;  %v81_v33 = vpop.f32.mrb[2].mxu0 }
  0xde   :  { %v82_v34 = vadd.f32 %v81_v33, %v32_v25  ;;  %v83_v35 = vpop.f32.mrb[3].mxu0 }
  0xdf   :  { %v88_v36 = vcombine.low %v78_v29, %v80_v31  ;;  %v102_v37 = vcombine.high %v78_v29, %v80_v31  ;;  %v84_v38 = vadd.f32 %v83_v35, %v36_v26 }
  0xe1   :  { %v95_v39 = vrot.slane %v88_v36, %v1689_v32  ;;  %1196 = vst.sshfl [vmem:[#allocation2] sm:$0x33 pattern:$0x76325410] %v88_v36  ;;  %v109_v40 = vrot.slane %v102_v37, %v1689_v32  ;;  %v119_v41 = vcombine.low %v82_v34, %v84_v38  ;;  %v134_v42 = vcombine.high %v82_v34, %v84_v38 }
  0xe2   :  { %1197 = vst.sshfl [vmem:[#allocation2 + $0x8] sm:$0x33 pattern:$0x76325410] %v102_v37 }
  0xe3   :  { %v98_v43 = vcombine.high %v95_v39, %v95_v39  ;;  %v113_v44 = vcombine.high %v109_v40, %v109_v40  ;;  %v126_v45 = vrot.slane %v119_v41, %v1689_v32  ;;  %1198 = vst.sshfl [vmem:[#allocation2 + $0x10] sm:$0x33 pattern:$0x76325410] %v119_v41  ;;  %v141_v46 = vrot.slane %v134_v42, %v1689_v32 }
  0xe4   :  { %1199 = vst.sshfl [vmem:[#allocation2 + $0x18] sm:$0x33 pattern:$0x76325410] %v134_v42 }
  0xe5   :  { %101 = vst [vmem:[#allocation2 + $0x4] sm:$0xf] %v98_v43  ;;  %116 = vst [vmem:[#allocation2 + $0xc] sm:$0xf] %v113_v44  ;;  %v130_v47 = vcombine.high %v126_v45, %v126_v45  ;;  %v145_v48 = vcombine.high %v141_v46, %v141_v46 }
  0xe7   :  { %133 = vst [vmem:[#allocation2 + $0x14] sm:$0xf] %v130_v47  ;;  %148 = vst [vmem:[#allocation2 + $0x1c] sm:$0xf] %v145_v48 }
  0xe8 LB: > { %v1718_v53 = vpack.c.bf16 %v1654_v11, %v1649_v10  ;;  %v1598_v54 = vmov 0.0|0.0   ;;  %v1724_v55 = vpack.c.bf16 %v1674_v15, %v1669_v14  ;;  %v185_v56 = vrot.slane %v1590_v52, %v1689_v32  ;;  %s1599_s3 = smov 32   ;;  %s1765_s17 = sshll.u32 %s1594_s2, 2  ;;  %s1594_s2 = sphi %s1703_s2, %s163_s2   ;;  %v1590_v52 = vphi %v1701_v52, %v998_v52   ;;  %v1586_v51 = vphi %v1699_v51, %v992_v51   ;;  %v1582_v50 = vphi %v1697_v50, %v1098_v50   ;;  %v1578_v49 = vphi %v1695_v49, %v1092_v49  }
  0xe9   : > { %1397 = vmatprep.subr.bf16.mxu0 %v1598_v54  ;;  %1403 = vmatprep.subr.bf16.mxu1 %v1598_v54  ;;  %v1730_v57 = vpack.c.bf16 %v1664_v13, %v1659_v12  ;;  %v1736_v58 = vpack.c.bf16 %v1684_v17, %v1679_v16  ;;  %v293_v59 = vrot.slane %v1582_v50, %v1689_v32  ;;  %vm1600_vm1 = vmmov 0   ;;  %s169_s18 = ssub.s32 7, %s1765_s17  ;;  %s1258_s19 = sshll.u32 %s1594_s2, 4 }
  0xea   : > { %1399 = vmatpush3.bf16.msra.mxu0 %v1718_v53  ;;  %1405 = vmatpush3.bf16.msra.mxu1 %v1724_v55  ;;  %v1601_v60 = vmov 0.0   ;;  %vm188_vm2 = vcmask 261120   ;;  %s1259_s20 = sshll.u32 %s169_s18, 2  ;;  %s1771_s21 = scalar_lea.vmem [#allocation2], %s1258_s19  ;;  %vm408_vm3 = vcmask 254976  }
  0xeb   : > { %1400 = vmatprep.subr.bf16.mxu0 %v1598_v54  ;;  %186 = vrot.lane.b32.xlu0 %v185_v56, %s1599_s3  ;;  %s176_s22 = scalar_lea.vmem [#allocation2], %s1259_s20  ;;  %s1602_s23 = smov 64  }
  0xec   : > { %1317 = vmatprep.mubr.msk.f32.mxu0 %vm1600_vm1, %v1601_v60  ;;  %1406 = vmatprep.subr.bf16.mxu1 %v1598_v54  ;;  %s1257_s24 = sshll.u32 %s1594_s2, 3  ;;  %s1213_s28 = sshll.u32 %s169_s18, 1 }
  0xed   : > { %1328 = vmatprep.mubr.msk.f32.mxu1 %vm1600_vm1, %v1601_v60  ;;  %s1796_s27 = scalar_lea.vmem %s1922_s4, %s1257_s24  ;;  %s1137_s30 = scalar_lea.vmem %s1922_s4, %s1213_s28 }
  0xee   : > { %1402 = vmatpush3.bf16.msra.mxu0 %v1730_v57  ;;  %1408 = vmatpush3.bf16.msra.mxu1 %v1736_v58  ;;  %v173_v63 = vld [vmem:[%s1771_s21] sm:$0xf]  ;;  %s425_s5 = ssub.s32 6, %s1765_s17  ;;  %v1217_v47 = vld [vmem:[%s1771_s21 + $0x4] sm:$0xf]  ;;  %s659_s11 = ssub.s32 5, %s1765_s17 }
  0xef   : > { %1409 = vmatprep.subr.bf16.mxu0 %v1598_v54  ;;  %294 = vrot.lane.b32.xlu0 %v293_v59, %s1599_s3  ;;  %v177_v0 = vld [vmem:[%s176_s22] sm:$0xf]  ;;  %s1261_s0 = sshll.u32 %s425_s5, 2  ;;  %s1227_s7 = sshll.u32 %s425_s5, 1 }
  0xf0   : > { %1415 = vmatprep.subr.bf16.mxu1 %v1598_v54  ;;  %v369_v4 = vrot.slane %v177_v0, 2  ;;  %s432_s6 = scalar_lea.vmem [#allocation2], %s1261_s0  ;;  %s1150_s10 = scalar_lea.vmem %s1922_s4, %s1227_s7 }
  0xf1   : > { %v433_v48 = vld [vmem:[%s432_s6] sm:$0xf]  ;;  %s1264_s12 = sshll.u32 %s659_s11, 2  ;;  %s1241_s14 = sshll.u32 %s659_s11, 1 }
  0xf2   : > { %v604_v52 = vrot.slane %v433_v48, 2  ;;  %s666_s13 = scalar_lea.vmem [#allocation2], %s1264_s12  ;;  %s1163_s18 = scalar_lea.vmem %s1922_s4, %s1241_s14 }
  0xf3   : > { %s893_s19 = ssub.s32 4, %s1765_s17  ;;  %s163_s2 = sadd.s32 1, %s1594_s2  }
  0xf4   : > { %s1267_s20 = sshll.u32 %s893_s19, 2  ;;  %p160_p0 = scmp.ge.s32.totalorder %s163_s2, 2  }
  0xf5   : > { %s900_s22 = scalar_lea.vmem [#allocation2], %s1267_s20 }
 0x15d   : > { %v187_v61 = vpop.permute.xlu0 %186 }
 0x15e   : > { %1318 = vmatmul.mubr.msk.f32.vlgmr.msra.gmra.mrb[0].mxu0 %vm188_vm2, %v187_v61 }
 0x15f   : > { %1411 = vmatpush3.bf16.msra.mxu0 %v1718_v53  ;;  %1339 = vmatprep.mubr.msk.f32.mxu0 %vm1600_vm1, %v1601_v60 }
 0x160   : > { %1412 = vmatprep.subr.bf16.mxu0 %v1598_v54 }
 0x161   : > { %v295_v62 = vpop.permute.xlu0 %294 }
 0x162   : > { %1329 = vmatmul.mubr.msk.f32.vlgmr.msra.gmra.mrb[0].mxu1 %vm188_vm2, %v295_v62 }
 0x163   : > { %1414 = vmatpush3.bf16.msra.mxu0 %v1730_v57  ;;  %1417 = vmatpush3.bf16.msra.mxu1 %v1724_v55 }
 0x164   : > { %1418 = vmatprep.subr.bf16.mxu1 %v1598_v54  ;;  %1350 = vmatprep.mubr.msk.f32.mxu1 %vm1600_vm1, %v1601_v60 }
 0x165   : > { %1421 = vmatprep.subr.bf16.mxu0 %v1598_v54 }
 0x167   : > { %1420 = vmatpush3.bf16.msra.mxu1 %v1736_v58 }
 0x168   : > { %1427 = vmatprep.subr.bf16.mxu1 %v1598_v54 }
 0x231   : > { %v257_v1 = vpop.f32.mrb[0].mxu0 }
 0x232   : > { %v261_v2 = vadd.f32 %v257_v1, %v173_v63  ;;  %v1319_v3 = vpop.f32.mrb[1].mxu0 }
 0x234   : > { %1492 = vtanh.f32 %v261_v2  ;;  %v1210_v18 = vmul.f32 -1.442695, %v261_v2 }
 0x235   : > { %v364_v5 = vpop.f32.mrb[0].mxu1 }
 0x236   : > { %v371_v6 = vadd.f32 %v369_v4, %v364_v5  ;;  %v1330_v7 = vpop.f32.mrb[1].mxu1 }
 0x238   : > { %1494 = vtanh.f32 %v371_v6  ;;  %v1212_v19 = vmul.f32 -1.442695, %v371_v6 }
 0x239   : > { %1496 = vpow2.f32 %v1210_v18 }
 0x23a   : > { %1498 = vpow2.f32 %v1212_v19 }
 0x23e   : > { %v1493_v8 = vpop.eup %1492 }
 0x23f   : > { %271 = vrot.lane.b32.xlu1 %v1493_v8, %s1602_s23 }
 0x242   : > { %v1495_v9 = vpop.eup %1494 }
 0x243   : > { %381 = vrot.lane.b32.xlu1 %v1495_v9, %s1602_s23  ;;  %v1497_v20 = vpop.eup %1496 }
 0x244   : > { %v265_v21 = vadd.f32 1.0, %v1497_v20  ;;  %v1499_v22 = vpop.eup %1498 }
 0x245   : > { %v375_v23 = vadd.f32 1.0, %v1499_v22 }
 0x246   : > { %1500 = vrcp.f32 %v265_v21 }
 0x247   : > { %1502 = vrcp.f32 %v375_v23 }
 0x250   : > { %v1501_v24 = vpop.eup %1500 }
 0x251   : > { %v1503_v27 = vpop.eup %1502  ;;  %v269_v30 = vmul.f32 %v1586_v51, %v1501_v24 }
 0x252   : > { %v379_v34 = vmul.f32 %v1578_v49, %v1503_v27 }
 0x2b1   : > { %v272_v25 = vpop.permute.xlu1 %271 }
 0x2b2   : > { %v274_v26 = vmul.f32 %v1501_v24, %v272_v25 }
 0x2b4   : > { %276 = vrot.lane.b32.xlu0 %v274_v26, %s1599_s3 }
 0x2b5   : > { %v382_v28 = vpop.permute.xlu1 %381 }
 0x2b6   : > { %v384_v29 = vmul.f32 %v1503_v27, %v382_v28 }
 0x2b8   : > { %386 = vrot.lane.b32.xlu1 %v384_v29, %s1599_s3 }
 0x326   : > { %v277_v31 = vpop.permute.xlu0 %276 }
 0x327   : > { %v1779_v33 = vadd.f32 %v277_v31, %v269_v30 }
 0x329   : > { %1504 = vtanh.f32 %v1779_v33 }
 0x32a   : > { %v387_v35 = vpop.permute.xlu1 %386 }
 0x32b   : > { %v1783_v36 = vadd.f32 %v387_v35, %v379_v34 }
 0x32d   : > { %1506 = vtanh.f32 %v1783_v36 }
 0x333   : > { %v1505_v37 = vpop.eup %1504 }
 0x334   : > { %282 = vrot.lane.b32.xlu0 %v1505_v37, %s1602_s23  ;;  %v667_v37 = vld [vmem:[%s666_s13] sm:$0xf] }
 0x337   : > { %v1507_v38 = vpop.eup %1506 }
 0x338   : > { %392 = vrot.lane.b32.xlu1 %v1507_v38, %s1602_s23 }
 0x3a6   : > { %v283_v39 = vpop.permute.xlu0 %282 }
 0x3a7   : > { %v285_v40 = vmul.f32 %v1501_v24, %v283_v39 }
 0x3a9   : > { %v403_v41 = vrot.slane %v285_v40, %v1689_v32 }
 0x3aa   : > { %v393_v42 = vpop.permute.xlu1 %392 }
 0x3ab   : > { %v395_v43 = vmul.f32 %v1503_v27, %v393_v42  ;;  %404 = vrot.lane.b32.xlu0 %v403_v41, %s1599_s3  ;;  %v838_v41 = vrot.slane %v667_v37, 2 }
 0x3ad   : > { %v417_v44 = vrot.slane %v395_v43, %v1689_v32 }
 0x3af   : > { %418 = vrot.lane.b32.xlu1 %v417_v44, %s1599_s3 }
 0x41d   : > { %v405_v45 = vpop.permute.xlu0 %404 }
 0x41e   : > { %409 = vst.msk [vmem:[%s1796_s27] sm:$0x3] %vm408_vm3, %v405_v45  ;;  %1340 = vmatmul.mubr.msk.f32.vlgmr.msra.gmra.mrb[2].mxu0 %vm188_vm2, %v405_v45 }
 0x41f   : > { %1423 = vmatpush3.bf16.msra.mxu0 %v1718_v53  ;;  %1361 = vmatprep.mubr.msk.f32.mxu0 %vm1600_vm1, %v1601_v60 }
 0x420   : > { %1424 = vmatprep.subr.bf16.mxu0 %v1598_v54 }
 0x421   : > { %v419_v46 = vpop.permute.xlu1 %418 }
 0x422   : > { %1214 = vst.msk [vmem:[%s1137_s30 + $0x10] sm:$0x3] %vm408_vm3, %v419_v46  ;;  %1351 = vmatmul.mubr.msk.f32.vlgmr.msra.gmra.mrb[2].mxu1 %vm188_vm2, %v419_v46 }
 0x423   : > { %1426 = vmatpush3.bf16.msra.mxu0 %v1730_v57  ;;  %1429 = vmatpush3.bf16.msra.mxu1 %v1724_v55 }
 0x424   : > { %1430 = vmatprep.subr.bf16.mxu1 %v1598_v54  ;;  %1372 = vmatprep.mubr.msk.f32.mxu1 %vm1600_vm1, %v1601_v60 }
 0x425   : > { %1433 = vmatprep.subr.bf16.mxu0 %v1598_v54 }
 0x427   : > { %1432 = vmatpush3.bf16.msra.mxu1 %v1736_v58 }
 0x428   : > { %1439 = vmatprep.subr.bf16.mxu1 %v1598_v54 }
 0x4f1   : > { %v502_v49 = vpop.f32.mrb[2].mxu0 }
 0x4f2   : > { %v506_v50 = vadd.f32 %v1217_v47, %v502_v49  ;;  %v1341_v51 = vpop.f32.mrb[3].mxu0 }
 0x4f4   : > { %1508 = vtanh.f32 %v506_v50  ;;  %v1221_v0 = vmul.f32 -1.442695, %v506_v50 }
 0x4f5   : > { %v599_v56 = vpop.f32.mrb[2].mxu1 }
 0x4f6   : > { %v606_v59 = vadd.f32 %v604_v52, %v599_v56  ;;  %v1352_v61 = vpop.f32.mrb[3].mxu1 }
 0x4f8   : > { %1510 = vtanh.f32 %v606_v59  ;;  %v1223_v1 = vmul.f32 -1.442695, %v606_v59 }
 0x4f9   : > { %1512 = vpow2.f32 %v1221_v0 }
 0x4fa   : > { %1514 = vpow2.f32 %v1223_v1 }
 0x4fe   : > { %v1509_v62 = vpop.eup %1508 }
 0x4ff   : > { %516 = vrot.lane.b32.xlu0 %v1509_v62, %s1602_s23 }
 0x502   : > { %v1511_v63 = vpop.eup %1510 }
 0x503   : > { %616 = vrot.lane.b32.xlu1 %v1511_v63, %s1602_s23  ;;  %v1513_v2 = vpop.eup %1512 }
 0x504   : > { %v510_v3 = vadd.f32 1.0, %v1513_v2  ;;  %v1515_v4 = vpop.eup %1514 }
 0x505   : > { %v610_v5 = vadd.f32 1.0, %v1515_v4 }
 0x506   : > { %1516 = vrcp.f32 %v510_v3 }
 0x507   : > { %1518 = vrcp.f32 %v610_v5 }
 0x510   : > { %v1517_v6 = vpop.eup %1516 }
 0x511   : > { %v1519_v9 = vpop.eup %1518  ;;  %v514_v20 = vmul.f32 %v1517_v6, %v1779_v33 }
 0x512   : > { %v614_v23 = vmul.f32 %v1519_v9, %v1783_v36 }
 0x571   : > { %v517_v7 = vpop.permute.xlu0 %516 }
 0x572   : > { %v519_v8 = vmul.f32 %v1517_v6, %v517_v7 }
 0x574   : > { %521 = vrot.lane.b32.xlu0 %v519_v8, %s1599_s3 }
 0x575   : > { %v617_v18 = vpop.permute.xlu1 %616 }
 0x576   : > { %v619_v19 = vmul.f32 %v1519_v9, %v617_v18 }
 0x578   : > { %621 = vrot.lane.b32.xlu1 %v619_v19, %s1599_s3 }
 0x5e6   : > { %v522_v21 = vpop.permute.xlu0 %521 }
 0x5e7   : > { %v1829_v22 = vadd.f32 %v522_v21, %v514_v20  ;;  %v1245_v20 = vld [vmem:[%s1771_s21 + $0xc] sm:$0xf]  ;;  %v901_v21 = vld [vmem:[%s900_s22] sm:$0xf] }
 0x5e9   : > { %1520 = vtanh.f32 %v1829_v22 }
 0x5ea   : > { %v622_v24 = vpop.permute.xlu1 %621 }
 0x5eb   : > { %v1833_v25 = vadd.f32 %v622_v24, %v614_v23 }
 0x5ed   : > { %1522 = vtanh.f32 %v1833_v25 }
 0x5f3   : > { %v1521_v26 = vpop.eup %1520 }
 0x5f4   : > { %527 = vrot.lane.b32.xlu0 %v1521_v26, %s1602_s23 }
 0x5f7   : > { %v1523_v27 = vpop.eup %1522 }
 0x5f8   : > { %627 = vrot.lane.b32.xlu1 %v1523_v27, %s1602_s23 }
 0x666   : > { %v528_v28 = vpop.permute.xlu0 %527 }
 0x667   : > { %v530_v29 = vmul.f32 %v1517_v6, %v528_v28 }
 0x669   : > { %v638_v30 = vrot.slane %v530_v29, %v1689_v32 }
 0x66a   : > { %v628_v31 = vpop.permute.xlu1 %627 }
 0x66b   : > { %v630_v33 = vmul.f32 %v1519_v9, %v628_v31  ;;  %639 = vrot.lane.b32.xlu0 %v638_v30, %s1599_s3 }
 0x66d   : > { %v651_v34 = vrot.slane %v630_v33, %v1689_v32 }
 0x66f   : > { %652 = vrot.lane.b32.xlu1 %v651_v34, %s1599_s3 }
 0x6dd   : > { %v640_v35 = vpop.permute.xlu0 %639 }
 0x6de   : > { %1226 = vst.msk [vmem:[%s1796_s27 + $0x2] sm:$0x3] %vm408_vm3, %v640_v35  ;;  %1362 = vmatmul.mubr.msk.f32.vlgmr.msra.gmra.mrb[4].mxu0 %vm188_vm2, %v640_v35 }
 0x6df   : > { %1435 = vmatpush3.bf16.msra.mxu0 %v1718_v53  ;;  %1383 = vmatprep.mubr.msk.f32.mxu0 %vm1600_vm1, %v1601_v60  ;;  %v1231_v53 = vld [vmem:[%s1771_s21 + $0x8] sm:$0xf]  ;;  %s1255_s21 = sshll.u32 %s893_s19, 1 }
 0x6e0   : > { %1436 = vmatprep.subr.bf16.mxu0 %v1598_v54 }
 0x6e1   : > { %v653_v36 = vpop.permute.xlu1 %652 }
 0x6e2   : > { %1228 = vst.msk [vmem:[%s1150_s10 + $0x10] sm:$0x3] %vm408_vm3, %v653_v36  ;;  %1373 = vmatmul.mubr.msk.f32.vlgmr.msra.gmra.mrb[4].mxu1 %vm188_vm2, %v653_v36 }
 0x6e3   : > { %1438 = vmatpush3.bf16.msra.mxu0 %v1730_v57  ;;  %1441 = vmatpush3.bf16.msra.mxu1 %v1724_v55 }
 0x6e4   : > { %1442 = vmatprep.subr.bf16.mxu1 %v1598_v54  ;;  %1394 = vmatprep.mubr.msk.f32.mxu1 %vm1600_vm1, %v1601_v60 }
 0x6e7   : > { %1444 = vmatpush3.bf16.msra.mxu1 %v1736_v58 }
 0x7b1   : > { %v736_v38 = vpop.f32.mrb[4].mxu0 }
 0x7b2   : > { %v740_v39 = vadd.f32 %v1231_v53, %v736_v38  ;;  %v1363_v40 = vpop.f32.mrb[5].mxu0 }
 0x7b4   : > { %1524 = vtanh.f32 %v740_v39  ;;  %v1235_v58 = vmul.f32 -1.442695, %v740_v39 }
 0x7b5   : > { %v833_v57 = vpop.f32.mrb[4].mxu1 }
 0x7b6   : > { %v840_v55 = vadd.f32 %v838_v41, %v833_v57  ;;  %v1374_v42 = vpop.f32.mrb[5].mxu1 }
 0x7b8   : > { %1526 = vtanh.f32 %v840_v55  ;;  %v1237_v43 = vmul.f32 -1.442695, %v840_v55 }
 0x7b9   : > { %1528 = vpow2.f32 %v1235_v58 }
 0x7ba   : > { %1530 = vpow2.f32 %v1237_v43 }
 0x7be   : > { %v1525_v54 = vpop.eup %1524 }
 0x7bf   : > { %750 = vrot.lane.b32.xlu0 %v1525_v54, %s1602_s23 }
 0x7c2   : > { %v1527_v60 = vpop.eup %1526 }
 0x7c3   : > { %850 = vrot.lane.b32.xlu1 %v1527_v60, %s1602_s23  ;;  %v1529_v44 = vpop.eup %1528 }
 0x7c4   : > { %v744_v45 = vadd.f32 1.0, %v1529_v44  ;;  %v1531_v46 = vpop.eup %1530 }
 0x7c5   : > { %v844_v47 = vadd.f32 1.0, %v1531_v46 }
 0x7c6   : > { %1532 = vrcp.f32 %v744_v45 }
 0x7c7   : > { %1534 = vrcp.f32 %v844_v47 }
 0x7d0   : > { %v1533_v48 = vpop.eup %1532 }
 0x7d1   : > { %v1535_v51 = vpop.eup %1534  ;;  %v748_v59 = vmul.f32 %v1533_v48, %v1829_v22 }
 0x7d2   : > { %v848_v63 = vmul.f32 %v1535_v51, %v1833_v25  ;;  %v1072_v25 = vrot.slane %v901_v21, 2 }
 0x831   : > { %v751_v49 = vpop.permute.xlu0 %750 }
 0x832   : > { %v753_v50 = vmul.f32 %v1533_v48, %v751_v49 }
 0x834   : > { %755 = vrot.lane.b32.xlu0 %v753_v50, %s1599_s3 }
 0x835   : > { %v851_v52 = vpop.permute.xlu1 %850 }
 0x836   : > { %v853_v56 = vmul.f32 %v1535_v51, %v851_v52 }
 0x838   : > { %855 = vrot.lane.b32.xlu1 %v853_v56, %s1599_s3 }
 0x8a6   : > { %v756_v61 = vpop.permute.xlu0 %755 }
 0x8a7   : > { %v758_v62 = vadd.f32 %v756_v61, %v748_v59 }
 0x8a9   : > { %1536 = vtanh.f32 %v758_v62 }
 0x8aa   : > { %v856_v0 = vpop.permute.xlu1 %855 }
 0x8ab   : > { %v858_v1 = vadd.f32 %v856_v0, %v848_v63 }
 0x8ad   : > { %1538 = vtanh.f32 %v858_v1 }
 0x8b3   : > { %v1537_v2 = vpop.eup %1536 }
 0x8b4   : > { %761 = vrot.lane.b32.xlu0 %v1537_v2, %s1602_s23 }
 0x8b7   : > { %v1539_v3 = vpop.eup %1538 }
 0x8b8   : > { %861 = vrot.lane.b32.xlu1 %v1539_v3, %s1602_s23 }
 0x926   : > { %v762_v4 = vpop.permute.xlu0 %761 }
 0x927   : > { %v764_v5 = vmul.f32 %v1533_v48, %v762_v4 }
 0x929   : > { %v872_v6 = vrot.slane %v764_v5, %v1689_v32 }
 0x92a   : > { %v862_v7 = vpop.permute.xlu1 %861 }
 0x92b   : > { %v864_v8 = vmul.f32 %v1535_v51, %v862_v7  ;;  %873 = vrot.lane.b32.xlu0 %v872_v6, %s1599_s3 }
 0x92d   : > { %v885_v9 = vrot.slane %v864_v8, %v1689_v32 }
 0x92f   : > { %886 = vrot.lane.b32.xlu1 %v885_v9, %s1599_s3 }
 0x99d   : > { %v874_v18 = vpop.permute.xlu0 %873 }
 0x99e   : > { %1240 = vst.msk [vmem:[%s1796_s27 + $0x4] sm:$0x3] %vm408_vm3, %v874_v18  ;;  %1384 = vmatmul.mubr.msk.f32.vlgmr.msra.gmra.mrb[6].mxu0 %vm188_vm2, %v874_v18 }
 0x9a1   : > { %v887_v19 = vpop.permute.xlu1 %886 }
 0x9a2   : > { %1242 = vst.msk [vmem:[%s1163_s18 + $0x10] sm:$0x3] %vm408_vm3, %v887_v19  ;;  %1395 = vmatmul.mubr.msk.f32.vlgmr.msra.gmra.mrb[6].mxu1 %vm188_vm2, %v887_v19 }
 0xa71   : > { %v970_v22 = vpop.f32.mrb[6].mxu0 }
 0xa72   : > { %v974_v23 = vadd.f32 %v1245_v20, %v970_v22  ;;  %v1385_v24 = vpop.f32.mrb[7].mxu0 }
 0xa74   : > { %1540 = vtanh.f32 %v974_v23  ;;  %v1249_v31 = vmul.f32 -1.442695, %v974_v23 }
 0xa75   : > { %v1067_v26 = vpop.f32.mrb[6].mxu1 }
 0xa76   : > { %v1074_v27 = vadd.f32 %v1072_v25, %v1067_v26  ;;  %v1396_v28 = vpop.f32.mrb[7].mxu1 }
 0xa78   : > { %1542 = vtanh.f32 %v1074_v27  ;;  %v1251_v33 = vmul.f32 -1.442695, %v1074_v27 }
 0xa79   : > { %1544 = vpow2.f32 %v1249_v31 }
 0xa7a   : > { %1546 = vpow2.f32 %v1251_v33 }
 0xa7e   : > { %v1541_v29 = vpop.eup %1540 }
 0xa7f   : > { %984 = vrot.lane.b32.xlu0 %v1541_v29, %s1602_s23 }
 0xa82   : > { %v1543_v30 = vpop.eup %1542 }
 0xa83   : > { %1084 = vrot.lane.b32.xlu1 %v1543_v30, %s1602_s23  ;;  %v1545_v34 = vpop.eup %1544 }
 0xa84   : > { %v978_v35 = vadd.f32 1.0, %v1545_v34  ;;  %v1547_v36 = vpop.eup %1546 }
 0xa85   : > { %v1078_v53 = vadd.f32 1.0, %v1547_v36 }
 0xa86   : > { %1548 = vrcp.f32 %v978_v35 }
 0xa87   : > { %1550 = vrcp.f32 %v1078_v53 }
 0xa90   : > { %v1549_v37 = vpop.eup %1548 }
 0xa91   : > { %v1551_v40 = vpop.eup %1550  ;;  %v982_v55 = vmul.f32 %v1549_v37, %v758_v62 }
 0xa92   : > { %v1082_v54 = vmul.f32 %v1551_v40, %v858_v1 }
 0xaf1   : > { %v985_v38 = vpop.permute.xlu0 %984 }
 0xaf2   : > { %v987_v39 = vmul.f32 %v1549_v37, %v985_v38 }
 0xaf4   : > { %989 = vrot.lane.b32.xlu0 %v987_v39, %s1599_s3 }
 0xaf5   : > { %v1085_v41 = vpop.permute.xlu1 %1084 }
 0xaf6   : > { %v1087_v57 = vmul.f32 %v1551_v40, %v1085_v41 }
 0xaf8   : > { %1089 = vrot.lane.b32.xlu1 %v1087_v57, %s1599_s3 }
 0xb66   : > { %v990_v42 = vpop.permute.xlu0 %989 }
 0xb67   : > { %v992_v51 = vadd.f32 %v990_v42, %v982_v55  }
 0xb69   : > { %1552 = vtanh.f32 %v992_v51 }
 0xb6a   : > { %v1090_v60 = vpop.permute.xlu1 %1089 }
 0xb6b   : > { %v1092_v49 = vadd.f32 %v1090_v60, %v1082_v54  }
 0xb6d   : > { %1554 = vtanh.f32 %v1092_v49 }
 0xb73   : > { %v1553_v58 = vpop.eup %1552 }
 0xb74   : > { %995 = vrot.lane.b32.xlu0 %v1553_v58, %s1602_s23 }
 0xb77   : > { %v1555_v43 = vpop.eup %1554 }
 0xb78   : > { %1095 = vrot.lane.b32.xlu1 %v1555_v43, %s1602_s23  ;;  %s1176_s23 = scalar_lea.vmem %s1922_s4, %s1255_s21 }
 0xbe6   : > { %v996_v44 = vpop.permute.xlu0 %995 }
 0xbe7   : > { %v998_v52 = vmul.f32 %v1549_v37, %v996_v44  }
 0xbe9   : > { %v1106_v45 = vrot.slane %v998_v52, %v1689_v32 }
 0xbea   : > { %v1096_v46 = vpop.permute.xlu1 %1095 }
 0xbeb   : > { %v1098_v50 = vmul.f32 %v1551_v40, %v1096_v46   ;;  %1107 = vrot.lane.b32.xlu0 %v1106_v45, %s1599_s3 }
 0xbed   : > { %v1119_v47 = vrot.slane %v1098_v50, %v1689_v32 }
 0xbef   : > { %1120 = vrot.lane.b32.xlu1 %v1119_v47, %s1599_s3 }
 0xc5c   :  { %162 = sbr.rel (!%p160_p0) target bundleno = 232 (0xe8), region = 67 }
 0xc5d   : > { %v1108_v48 = vpop.permute.xlu0 %1107 }
 0xc5e   : > { %1254 = vst.msk [vmem:[%s1796_s27 + $0x6] sm:$0x3] %vm408_vm3, %v1108_v48 }
 0xc61   : > { %v1121_v56 = vpop.permute.xlu1 %1120 }
 0xc62   : > { %1256 = vst.msk [vmem:[%s1176_s23 + $0x10] sm:$0x3] %vm408_vm3, %v1121_v56 }

// kernel: _forward_from_ids.3
= control target key start
LH: loop header
LB: loop body
LE: loop exit
PB: predicated region body
PF: predicated region fallthrough
CT: control target
= control target key end

     0   :  { %11 = vsyncpa [#allocation4], 0  ;;  %v1916_v6 = vmov 0   ;;  %vm57_vm0 = vcmask 261120   ;;  %v152_v39 = vlaneseq  ;;  %v1917_v44 = vmov 1983009808   ;;  %s2323_s0 = inlined_call_operand.vmem [shape: f32[2,16,32], index: 0, kind: input, shape index: {}]   ;;  %s2324_s1 = inlined_call_operand.vmem [shape: f32[2,32,256], index: 1, kind: input, shape index: {}]   ;;  %s2325_s2 = inlined_call_operand.vmem [shape: f32[2,32,128], index: 2, kind: input, shape index: {}]   ;;  %s2326_s3 = inlined_call_operand.vmem [shape: f32[1,256], index: 3, kind: input, shape index: {}]   ;;  %s2327_s4 = inlined_call_operand.vmem [shape: f32[2,32,4], index: 4, kind: input, shape index: {}]   ;;  %s2328_s5 = inlined_call_operand.vmem [shape: f32[1,4], index: 5, kind: input, shape index: {}]   ;;  %s2329_s6 = inlined_call_operand.hbm [shape: f32[2,4], index: 6, kind: output, shape index: {}]  }
   0x1   :  { %v1411_v0 = vld [vmem:[%s2324_s1 + $0x48] sm:$0xff]  ;;  %v1413_v1 = vld [vmem:[%s2324_s1 + $0x58] sm:$0xff]  ;;  %v1410_v5 = vld [vmem:[%s2324_s1 + $0x40] sm:$0xff]  ;;  %93 = vmatprep.mubr.bf16.mxu1 %v1916_v6  ;;  %139 = vmatprep.mubr.bf16.mxu0 %v1916_v6  ;;  %v170_v45 = vunpack.c.l.s4 %v1917_v44 }
   0x2   :  { %v54_v2 = vpack.c.bf16 %v1413_v1, %v1411_v0  ;;  %v29_v3 = vld [vmem:[%s2324_s1 + $0x8] sm:$0xff]  ;;  %v31_v4 = vld [vmem:[%s2324_s1 + $0x18] sm:$0xff]  ;;  %v1412_v8 = vld [vmem:[%s2324_s1 + $0x50] sm:$0xff]  ;;  %v153_v40 = vshrl.u32 %v152_v39, 7 }
   0x3   :  { %v37_v7 = vpack.c.bf16 %v31_v4, %v29_v3  ;;  %v28_v9 = vld [vmem:[%s2324_s1] sm:$0xff]  ;;  %v30_v10 = vld [vmem:[%s2324_s1 + $0x10] sm:$0xff]  ;;  %v53_v11 = vpack.c.bf16 %v1412_v8, %v1410_v5  ;;  %v1415_v13 = vld [vmem:[%s2324_s1 + $0x68] sm:$0xff]  ;;  %v171_v50 = vunpack.c.0.s8 %v170_v45 }
   0x4   :  { %61 = vmatprep.subr.bf16.mxu1 %v54_v2  ;;  %v36_v12 = vpack.c.bf16 %v30_v10, %v28_v9  ;;  %v1417_v14 = vld [vmem:[%s2324_s1 + $0x78] sm:$0xff]  ;;  %v33_v15 = vld [vmem:[%s2324_s1 + $0x28] sm:$0xff]  ;;  %v1414_v18 = vld [vmem:[%s2324_s1 + $0x60] sm:$0xff]  ;;  %v154_v41 = vsub.s32 0, %v153_v40  ;;  %v158_v43 = vsub.s32 1, %v153_v40 }
   0x5   :  { %107 = vmatprep.subr.bf16.mxu0 %v37_v7  ;;  %v56_v16 = vpack.c.bf16 %v1417_v14, %v1415_v13  ;;  %v35_v17 = vld [vmem:[%s2324_s1 + $0x38] sm:$0xff]  ;;  %v1416_v19 = vld [vmem:[%s2324_s1 + $0x70] sm:$0xff]  ;;  %62 = vmatpush1.bf16.msra.mxu1 %v53_v11  ;;  %v32_v22 = vld [vmem:[%s2324_s1 + $0x20] sm:$0xff]  ;;  %v2068_v62 = vsub.s32 %v171_v50, %v153_v40  ;;  %v2074_v14 = vmov 0.0  }
   0x6   :  { %108 = vmatpush1.bf16.msra.mxu0 %v36_v12  ;;  %v39_v20 = vpack.c.bf16 %v35_v17, %v33_v15  ;;  %v55_v21 = vpack.c.bf16 %v1416_v19, %v1414_v18  ;;  %v34_v23 = vld [vmem:[%s2324_s1 + $0x30] sm:$0xff]  ;;  %v1409_v26 = vld [vmem:[%s2323_s0 + $0x18] sm:$0xff]  ;;  %v25_v27 = vld [vmem:[%s2323_s0] sm:$0xff]  ;;  %v2076_v15 = vmov 0.0   ;;  %v2080_v17 = vmov 0.0  }
   0x7   :  { %v1408_v24 = vld [vmem:[%s2323_s0 + $0x10] sm:$0xff]  ;;  %63 = vmatprep.subr.bf16.mxu1 %v56_v16  ;;  %v38_v25 = vpack.c.bf16 %v34_v23, %v32_v22  ;;  %v26_v28 = vld [vmem:[%s2323_s0 + $0x8] sm:$0xff]  ;;  %v2028_v31 = vld [vmem:[%s2325_s2] sm:$0xff]  ;;  %v2078_v16 = vmov 0.0   ;;  %v2082_v18 = vmov 0.0   ;;  %v2084_v19 = vmov 0.0  }
   0x8   :  { %109 = vmatprep.subr.bf16.mxu0 %v39_v20  ;;  %v43_v29 = vpack.c.bf16 %v1409_v26, %v1408_v24  ;;  %v27_v30 = vpack.c.bf16 %v26_v28, %v25_v27  ;;  %v2033_v32 = vld [vmem:[%s2325_s2 + $0x8] sm:$0xff]  ;;  %v2038_v33 = vld [vmem:[%s2325_s2 + $0x10] sm:$0xff]  ;;  %v2043_v34 = vld [vmem:[%s2325_s2 + $0x18] sm:$0xff] }
   0x9   :  { %64 = vmatpush1.bf16.msra.mxu1 %v55_v21  ;;  %v2048_v35 = vld [vmem:[%s2325_s2 + $0x20] sm:$0xff]  ;;  %v2053_v36 = vld [vmem:[%s2325_s2 + $0x28] sm:$0xff]  ;;  %v2058_v37 = vld [vmem:[%s2325_s2 + $0x30] sm:$0xff] }
   0xa   :  { %110 = vmatpush1.bf16.msra.mxu0 %v38_v25  ;;  %v2063_v38 = vld [vmem:[%s2325_s2 + $0x38] sm:$0xff]  ;;  %v150_v42 = vld [vmem:[%s2326_s3] sm:$0x3]  ;;  %s2086_s2 = smov 0  }
   0xb   :  { %v155_v46 = vrot.slane %v150_v42, %v154_v41  ;;  %v159_v49 = vrot.slane %v150_v42, %v158_v43 }
   0xc   :  { %1418 = vmatmul.mubr.msk.bf16.vlgmr.msra.gmra.mrb[0].mxu1 %vm57_vm0, %v43_v29 }
   0xd   :  { %1419 = vmatmul.mubr.msk.bf16.vlgmr.msra.gmra.mrb[0].mxu0 %vm57_vm0, %v27_v30 }
  0xdf   :  { %v95_v47 = vpop.f32.mrb[0].mxu1 }
  0xe0   :  { %v141_v48 = vpop.f32.mrb[0].mxu0  ;;  %v97_v52 = vpop.f32.mrb[1].mxu1 }
  0xe1   :  { %v142_v51 = vadd.f32 %v141_v48, %v95_v47  ;;  %v143_v53 = vpop.f32.mrb[1].mxu0  ;;  %v99_v55 = vpop.f32.mrb[2].mxu1 }
  0xe2   :  { %v144_v54 = vadd.f32 %v143_v53, %v97_v52  ;;  %v145_v56 = vpop.f32.mrb[2].mxu0  ;;  %v101_v59 = vpop.f32.mrb[3].mxu1 }
  0xe3   :  { %v162_v57 = vadd.f32 %v155_v46, %v142_v51  ;;  %v146_v58 = vadd.f32 %v145_v56, %v99_v55  ;;  %v147_v60 = vpop.f32.mrb[3].mxu0 }
  0xe4   :  { %v163_v61 = vadd.f32 %v159_v49, %v144_v54  ;;  %v148_v63 = vadd.f32 %v147_v60, %v101_v59 }
  0xe5   :  { %v164_v0 = vadd.f32 %v155_v46, %v146_v58 }
  0xe6   :  { %v168_v1 = vcombine.low %v162_v57, %v163_v61  ;;  %v182_v2 = vcombine.high %v162_v57, %v163_v61  ;;  %v165_v3 = vadd.f32 %v159_v49, %v148_v63 }
  0xe8   :  { %v175_v4 = vrot.slane %v168_v1, %v2068_v62  ;;  %1420 = vst.sshfl [vmem:[#allocation2] sm:$0x33 pattern:$0x76325410] %v168_v1  ;;  %v189_v5 = vrot.slane %v182_v2, %v2068_v62  ;;  %v199_v6 = vcombine.low %v164_v0, %v165_v3  ;;  %v214_v7 = vcombine.high %v164_v0, %v165_v3 }
  0xe9   :  { %1421 = vst.sshfl [vmem:[#allocation2 + $0x8] sm:$0x33 pattern:$0x76325410] %v182_v2 }
  0xea   :  { %v178_v8 = vcombine.high %v175_v4, %v175_v4  ;;  %v193_v9 = vcombine.high %v189_v5, %v189_v5  ;;  %v206_v10 = vrot.slane %v199_v6, %v2068_v62  ;;  %1422 = vst.sshfl [vmem:[#allocation2 + $0x10] sm:$0x33 pattern:$0x76325410] %v199_v6  ;;  %v221_v11 = vrot.slane %v214_v7, %v2068_v62 }
  0xeb   :  { %1423 = vst.sshfl [vmem:[#allocation2 + $0x18] sm:$0x33 pattern:$0x76325410] %v214_v7 }
  0xec   :  { %181 = vst [vmem:[#allocation2 + $0x4] sm:$0xf] %v178_v8  ;;  %196 = vst [vmem:[#allocation2 + $0xc] sm:$0xf] %v193_v9  ;;  %v210_v12 = vcombine.high %v206_v10, %v206_v10  ;;  %v225_v13 = vcombine.high %v221_v11, %v221_v11 }
  0xee   :  { %213 = vst [vmem:[#allocation2 + $0x14] sm:$0xf] %v210_v12  ;;  %228 = vst [vmem:[#allocation2 + $0x1c] sm:$0xf] %v225_v13 }
  0xef LB: > { %v2107_v20 = vpack.c.bf16 %v2033_v32, %v2028_v31  ;;  %v1918_v21 = vmov 0.0|0.0   ;;  %v2113_v22 = vpack.c.bf16 %v2053_v36, %v2048_v35  ;;  %v267_v23 = vrot.slane %v1910_v19, %v2068_v62  ;;  %s1919_s3 = smov 32   ;;  %s2154_s29 = sshll.u32 %s1914_s2, 2  ;;  %s1914_s2 = sphi %s2086_s2, %s243_s2   ;;  %v1910_v19 = vphi %v2084_v19, %v1053_v19   ;;  %v1906_v18 = vphi %v2082_v18, %v1047_v18   ;;  %v1902_v17 = vphi %v2080_v17, %v2331_v17   ;;  %v1898_v16 = vphi %v2078_v16, %v1163_v16   ;;  %v1894_v15 = vphi %v2076_v15, %v1157_v15   ;;  %v1890_v14 = vphi %v2074_v14, %v2330_v14  }
  0xf0   : > { %1640 = vmatprep.subr.bf16.mxu0 %v1918_v21  ;;  %1646 = vmatprep.subr.bf16.mxu1 %v1918_v21  ;;  %v2119_v24 = vpack.c.bf16 %v2043_v34, %v2038_v33  ;;  %v2125_v25 = vpack.c.bf16 %v2063_v38, %v2058_v37  ;;  %v374_v26 = vrot.slane %v1898_v16, %v2068_v62  ;;  %vm1920_vm1 = vmmov 0   ;;  %s251_s30 = ssub.s32 7, %s2154_s29  ;;  %s1472_s7 = sshll.u32 %s1914_s2, 4 }
  0xf1   : > { %1642 = vmatpush3.bf16.msra.mxu0 %v2107_v20  ;;  %1648 = vmatpush3.bf16.msra.mxu1 %v2113_v22  ;;  %v1921_v27 = vmov 0.0   ;;  %s1473_s8 = sshll.u32 %s251_s30, 2  ;;  %s2158_s9 = scalar_lea.vmem [#allocation2], %s1472_s7 }
  0xf2   : > { %1643 = vmatprep.subr.bf16.mxu0 %v1918_v21  ;;  %268 = vrot.lane.b32.xlu0 %v267_v23, %s1919_s3  ;;  %s258_s10 = scalar_lea.vmem [#allocation2], %s1473_s8  ;;  %s1922_s11 = smov 64  }
  0xf3   : > { %1538 = vmatprep.mubr.msk.f32.mxu0 %vm1920_vm1, %v1921_v27  ;;  %1649 = vmatprep.subr.bf16.mxu1 %v1918_v21  ;;  %s480_s12 = ssub.s32 6, %s2154_s29  ;;  %s709_s14 = ssub.s32 5, %s2154_s29 }
  0xf4   : > { %1549 = vmatprep.mubr.msk.f32.mxu1 %vm1920_vm1, %v1921_v27  ;;  %s1475_s1 = sshll.u32 %s480_s12, 2  ;;  %s1477_s15 = sshll.u32 %s709_s14, 2 }
  0xf5   : > { %1645 = vmatpush3.bf16.msra.mxu0 %v2119_v24  ;;  %1651 = vmatpush3.bf16.msra.mxu1 %v2125_v25  ;;  %v255_v30 = vld [vmem:[%s2158_s9] sm:$0xf]  ;;  %s487_s13 = scalar_lea.vmem [#allocation2], %s1475_s1  ;;  %s716_s0 = scalar_lea.vmem [#allocation2], %s1477_s15 }
  0xf6   : > { %1652 = vmatprep.subr.bf16.mxu0 %v1918_v21  ;;  %375 = vrot.lane.b32.xlu0 %v374_v26, %s1919_s3  ;;  %v259_v39 = vld [vmem:[%s258_s10] sm:$0xf]  ;;  %s938_s16 = ssub.s32 4, %s2154_s29  ;;  %s243_s2 = sadd.s32 1, %s1914_s2  }
  0xf7   : > { %1658 = vmatprep.subr.bf16.mxu1 %v1918_v21  ;;  %v450_v43 = vrot.slane %v259_v39, 2  ;;  %v488_v16 = vld [vmem:[%s487_s13] sm:$0xf]  ;;  %s1479_s17 = sshll.u32 %s938_s16, 2  ;;  %p240_p0 = scmp.ge.s32.totalorder %s243_s2, 2  }
  0xf8   : > { %v679_v26 = vrot.slane %v488_v16, 2  ;;  %s945_s18 = scalar_lea.vmem [#allocation2], %s1479_s17  ;;  %v1467_v31 = vld [vmem:[%s2327_s4 + $0x38] sm:$0xff] (%p240_p0)  ;;  %v1166_v32 = vld [vmem:[%s2327_s4] sm:$0xff] (%p240_p0)  ;;  %v1167_v33 = vld [vmem:[%s2327_s4 + $0x8] sm:$0xff] (%p240_p0)  ;;  %s1924_s29 = smov (%p240_p0), 32  }
  0xf9   :  { %v1695_v35 = vpack.c.bf16 (%p240_p0), %v1167_v33, %v1166_v32  ;;  %vm1925_vm2 = vmmov (%p240_p0), 0   ;;  %v1926_v36 = vmov (%p240_p0), 0.0   ;;  %v1168_v37 = vld [vmem:[%s2327_s4 + $0x10] sm:$0xff] (%p240_p0)  ;;  %v1169_v38 = vld [vmem:[%s2327_s4 + $0x18] sm:$0xff] (%p240_p0)  ;;  %vm1347_vm3 = vcmask (%p240_p0), 25600  }
 0x164   : > { %v269_v28 = vpop.permute.xlu0 %268 }
 0x165   : > { %1539 = vmatmul.mubr.msk.f32.vlgmr.msra.gmra.mrb[0].mxu0 %vm57_vm0, %v269_v28 }
 0x166   : > { %1654 = vmatpush3.bf16.msra.mxu0 %v2107_v20  ;;  %1560 = vmatprep.mubr.msk.f32.mxu0 %vm1920_vm1, %v1921_v27 }
 0x167   : > { %1655 = vmatprep.subr.bf16.mxu0 %v1918_v21 }
 0x168   : > { %v376_v29 = vpop.permute.xlu0 %375 }
 0x169   : > { %1550 = vmatmul.mubr.msk.f32.vlgmr.msra.gmra.mrb[0].mxu1 %vm57_vm0, %v376_v29 }
 0x16a   : > { %1657 = vmatpush3.bf16.msra.mxu0 %v2119_v24  ;;  %1660 = vmatpush3.bf16.msra.mxu1 %v2113_v22 }
 0x16b   : > { %1661 = vmatprep.subr.bf16.mxu1 %v1918_v21  ;;  %1571 = vmatprep.mubr.msk.f32.mxu1 %vm1920_vm1, %v1921_v27 }
 0x16c   : > { %1664 = vmatprep.subr.bf16.mxu0 %v1918_v21 }
 0x16e   : > { %1663 = vmatpush3.bf16.msra.mxu1 %v2125_v25 }
 0x16f   : > { %1670 = vmatprep.subr.bf16.mxu1 %v1918_v21 }
 0x238   : > { %v338_v40 = vpop.f32.mrb[0].mxu0 }
 0x239   : > { %v342_v41 = vadd.f32 %v338_v40, %v255_v30  ;;  %v1540_v42 = vpop.f32.mrb[1].mxu0 }
 0x23b   : > { %1772 = vtanh.f32 %v342_v41  ;;  %v1434_v49 = vmul.f32 -1.442695, %v342_v41 }
 0x23c   : > { %v445_v44 = vpop.f32.mrb[0].mxu1 }
 0x23d   : > { %v452_v45 = vadd.f32 %v450_v43, %v445_v44  ;;  %v1551_v46 = vpop.f32.mrb[1].mxu1 }
 0x23f   : > { %1774 = vtanh.f32 %v452_v45  ;;  %v1436_v50 = vmul.f32 -1.442695, %v452_v45 }
 0x240   : > { %1776 = vpow2.f32 %v1434_v49 }
 0x241   : > { %1778 = vpow2.f32 %v1436_v50 }
 0x245   : > { %v1773_v47 = vpop.eup %1772 }
 0x246   : > { %352 = vrot.lane.b32.xlu1 %v1773_v47, %s1922_s11 }
 0x249   : > { %v1775_v48 = vpop.eup %1774 }
 0x24a   : > { %462 = vrot.lane.b32.xlu1 %v1775_v48, %s1922_s11  ;;  %v1777_v51 = vpop.eup %1776 }
 0x24b   : > { %v346_v52 = vadd.f32 1.0, %v1777_v51  ;;  %v1779_v53 = vpop.eup %1778 }
 0x24c   : > { %v456_v54 = vadd.f32 1.0, %v1779_v53 }
 0x24d   : > { %1780 = vrcp.f32 %v346_v52 }
 0x24e   : > { %1782 = vrcp.f32 %v456_v54 }
 0x257   : > { %v1781_v55 = vpop.eup %1780 }
 0x258   : > { %v1783_v58 = vpop.eup %1782  ;;  %v350_v61 = vmul.f32 %v1906_v18, %v1781_v55 }
 0x259   : > { %v460_v1 = vmul.f32 %v1894_v15, %v1783_v58  ;;  %v1439_v15 = vld [vmem:[%s2158_s9 + $0x4] sm:$0xf] }
 0x2b8   : > { %v353_v56 = vpop.permute.xlu1 %352 }
 0x2b9   : > { %v355_v57 = vmul.f32 %v1781_v55, %v353_v56 }
 0x2bb   : > { %357 = vrot.lane.b32.xlu0 %v355_v57, %s1919_s3 }
 0x2bc   : > { %v463_v59 = vpop.permute.xlu1 %462 }
 0x2bd   : > { %v465_v60 = vmul.f32 %v1783_v58, %v463_v59 }
 0x2bf   : > { %467 = vrot.lane.b32.xlu1 %v465_v60, %s1919_s3 }
 0x32d   : > { %v358_v63 = vpop.permute.xlu0 %357 }
 0x32e   : > { %v2166_v0 = vadd.f32 %v358_v63, %v350_v61 }
 0x330   : > { %1784 = vtanh.f32 %v2166_v0 }
 0x331   : > { %v468_v2 = vpop.permute.xlu1 %467 }
 0x332   : > { %v2170_v3 = vadd.f32 %v468_v2, %v460_v1 }
 0x334   : > { %1786 = vtanh.f32 %v2170_v3 }
 0x33a   : > { %v1785_v4 = vpop.eup %1784 }
 0x33b   : > { %363 = vrot.lane.b32.xlu0 %v1785_v4, %s1922_s11 }
 0x33e   : > { %v1787_v5 = vpop.eup %1786 }
 0x33f   : > { %473 = vrot.lane.b32.xlu1 %v1787_v5, %s1922_s11 }
 0x3ad   : > { %v364_v6 = vpop.permute.xlu0 %363 }
 0x3ae   : > { %v2175_v7 = vmul.f32 %v1781_v55, %v364_v6 }
 0x3b0   : > { %v496_v8 = vrot.slane %v2175_v7, %v2068_v62  ;;  %v477_v63 = vadd.f32 %v1902_v17, %v2175_v7  ;;  %v717_v7 = vld [vmem:[%s716_s0] sm:$0xf] }
 0x3b1   : > { %v474_v9 = vpop.permute.xlu1 %473 }
 0x3b2   : > { %v2179_v10 = vmul.f32 %v1783_v58, %v474_v9  ;;  %497 = vrot.lane.b32.xlu0 %v496_v8, %s1919_s3 }
 0x3b4   : > { %v603_v11 = vrot.slane %v2179_v10, %v2068_v62  ;;  %v478_v4 = vadd.f32 %v1890_v14, %v2179_v10 }
 0x3b6   : > { %604 = vrot.lane.b32.xlu1 %v603_v11, %s1919_s3 }
 0x424   : > { %v498_v12 = vpop.permute.xlu0 %497 }
 0x425   : > { %1561 = vmatmul.mubr.msk.f32.vlgmr.msra.gmra.mrb[2].mxu0 %vm57_vm0, %v498_v12  ;;  %v908_v12 = vrot.slane %v717_v7, 2 }
 0x426   : > { %1666 = vmatpush3.bf16.msra.mxu0 %v2107_v20  ;;  %1582 = vmatprep.mubr.msk.f32.mxu0 %vm1920_vm1, %v1921_v27 }
 0x427   : > { %1667 = vmatprep.subr.bf16.mxu0 %v1918_v21 }
 0x428   : > { %v605_v13 = vpop.permute.xlu1 %604 }
 0x429   : > { %1572 = vmatmul.mubr.msk.f32.vlgmr.msra.gmra.mrb[2].mxu1 %vm57_vm0, %v605_v13 }
 0x42a   : > { %1669 = vmatpush3.bf16.msra.mxu0 %v2119_v24  ;;  %1672 = vmatpush3.bf16.msra.mxu1 %v2113_v22 }
 0x42b   : > { %1673 = vmatprep.subr.bf16.mxu1 %v1918_v21  ;;  %1593 = vmatprep.mubr.msk.f32.mxu1 %vm1920_vm1, %v1921_v27 }
 0x42c   : > { %1676 = vmatprep.subr.bf16.mxu0 %v1918_v21 }
 0x42e   : > { %1675 = vmatpush3.bf16.msra.mxu1 %v2125_v25 }
 0x42f   : > { %1682 = vmatprep.subr.bf16.mxu1 %v1918_v21 }
 0x4f8   : > { %v567_v18 = vpop.f32.mrb[2].mxu0 }
 0x4f9   : > { %v571_v19 = vadd.f32 %v1439_v15, %v567_v18  ;;  %v1562_v23 = vpop.f32.mrb[3].mxu0 }
 0x4fb   : > { %1788 = vtanh.f32 %v571_v19  ;;  %v1443_v41 = vmul.f32 -1.442695, %v571_v19 }
 0x4fc   : > { %v674_v28 = vpop.f32.mrb[2].mxu1 }
 0x4fd   : > { %v681_v29 = vadd.f32 %v679_v26, %v674_v28  ;;  %v1573_v30 = vpop.f32.mrb[3].mxu1 }
 0x4ff   : > { %1790 = vtanh.f32 %v681_v29  ;;  %v1445_v42 = vmul.f32 -1.442695, %v681_v29 }
 0x500   : > { %1792 = vpow2.f32 %v1443_v41 }
 0x501   : > { %1794 = vpow2.f32 %v1445_v42 }
 0x505   : > { %v1789_v39 = vpop.eup %1788 }
 0x506   : > { %581 = vrot.lane.b32.xlu0 %v1789_v39, %s1922_s11 }
 0x509   : > { %v1791_v40 = vpop.eup %1790 }
 0x50a   : > { %691 = vrot.lane.b32.xlu1 %v1791_v40, %s1922_s11  ;;  %v1793_v43 = vpop.eup %1792 }
 0x50b   : > { %v575_v44 = vadd.f32 1.0, %v1793_v43  ;;  %v1795_v45 = vpop.eup %1794 }
 0x50c   : > { %v685_v46 = vadd.f32 1.0, %v1795_v45 }
 0x50d   : > { %1796 = vrcp.f32 %v575_v44 }
 0x50e   : > { %1798 = vrcp.f32 %v685_v46 }
 0x517   : > { %v1797_v47 = vpop.eup %1796 }
 0x518   : > { %v1799_v50 = vpop.eup %1798  ;;  %v579_v53 = vmul.f32 %v1797_v47, %v2166_v0 }
 0x519   : > { %v689_v56 = vmul.f32 %v1799_v50, %v2170_v3 }
 0x578   : > { %v582_v48 = vpop.permute.xlu0 %581 }
 0x579   : > { %v584_v49 = vmul.f32 %v1797_v47, %v582_v48 }
 0x57b   : > { %586 = vrot.lane.b32.xlu0 %v584_v49, %s1919_s3 }
 0x57c   : > { %v692_v51 = vpop.permute.xlu1 %691 }
 0x57d   : > { %v694_v52 = vmul.f32 %v1799_v50, %v692_v51 }
 0x57f   : > { %696 = vrot.lane.b32.xlu1 %v694_v52, %s1919_s3 }
 0x5ed   : > { %v587_v54 = vpop.permute.xlu0 %586 }
 0x5ee   : > { %v2206_v55 = vadd.f32 %v587_v54, %v579_v53 }
 0x5f0   : > { %1800 = vtanh.f32 %v2206_v55 }
 0x5f1   : > { %v697_v57 = vpop.permute.xlu1 %696 }
 0x5f2   : > { %v2210_v58 = vadd.f32 %v697_v57, %v689_v56 }
 0x5f4   : > { %1802 = vtanh.f32 %v2210_v58 }
 0x5fa   : > { %v1801_v59 = vpop.eup %1800 }
 0x5fb   : > { %592 = vrot.lane.b32.xlu0 %v1801_v59, %s1922_s11  ;;  %v1457_v59 = vld [vmem:[%s2158_s9 + $0xc] sm:$0xf] }
 0x5fe   : > { %v1803_v60 = vpop.eup %1802 }
 0x5ff   : > { %702 = vrot.lane.b32.xlu1 %v1803_v60, %s1922_s11  ;;  %v946_v60 = vld [vmem:[%s945_s18] sm:$0xf] }
 0x66d   : > { %v593_v61 = vpop.permute.xlu0 %592 }
 0x66e   : > { %v595_v0 = vmul.f32 %v1797_v47, %v593_v61 }
 0x670   : > { %v2217_v1 = vadd.f32 %v595_v0, %v477_v63  ;;  %v725_v2 = vrot.slane %v595_v0, %v2068_v62 }
 0x671   : > { %v703_v3 = vpop.permute.xlu1 %702 }
 0x672   : > { %v705_v5 = vmul.f32 %v1799_v50, %v703_v3  ;;  %726 = vrot.lane.b32.xlu0 %v725_v2, %s1919_s3 }
 0x674   : > { %v2223_v6 = vadd.f32 %v705_v5, %v478_v4  ;;  %v832_v8 = vrot.slane %v705_v5, %v2068_v62 }
 0x676   : > { %833 = vrot.lane.b32.xlu1 %v832_v8, %s1919_s3 }
 0x6e4   : > { %v727_v17 = vpop.permute.xlu0 %726 }
 0x6e5   : > { %1583 = vmatmul.mubr.msk.f32.vlgmr.msra.gmra.mrb[4].mxu0 %vm57_vm0, %v727_v17 }
 0x6e6   : > { %1678 = vmatpush3.bf16.msra.mxu0 %v2107_v20  ;;  %1604 = vmatprep.mubr.msk.f32.mxu0 %vm1920_vm1, %v1921_v27  ;;  %v1448_v20 = vld [vmem:[%s2158_s9 + $0x8] sm:$0xf] }
 0x6e7   : > { %1679 = vmatprep.subr.bf16.mxu0 %v1918_v21 }
 0x6e8   : > { %v834_v14 = vpop.permute.xlu1 %833 }
 0x6e9   : > { %1594 = vmatmul.mubr.msk.f32.vlgmr.msra.gmra.mrb[4].mxu1 %vm57_vm0, %v834_v14 }
 0x6ea   : > { %1681 = vmatpush3.bf16.msra.mxu0 %v2119_v24  ;;  %1684 = vmatpush3.bf16.msra.mxu1 %v2113_v22 }
 0x6eb   : > { %1685 = vmatprep.subr.bf16.mxu1 %v1918_v21  ;;  %1615 = vmatprep.mubr.msk.f32.mxu1 %vm1920_vm1, %v1921_v27 }
 0x6ee   : > { %1687 = vmatpush3.bf16.msra.mxu1 %v2125_v25 }
 0x7b8   : > { %v796_v9 = vpop.f32.mrb[4].mxu0 }
 0x7b9   : > { %v800_v10 = vadd.f32 %v1448_v20, %v796_v9  ;;  %v1584_v11 = vpop.f32.mrb[5].mxu0 }
 0x7bb   : > { %1804 = vtanh.f32 %v800_v10  ;;  %v1452_v25 = vmul.f32 -1.442695, %v800_v10 }
 0x7bc   : > { %v903_v24 = vpop.f32.mrb[4].mxu1 }
 0x7bd   : > { %v910_v13 = vadd.f32 %v908_v12, %v903_v24  ;;  %v1595_v22 = vpop.f32.mrb[5].mxu1 }
 0x7bf   : > { %1806 = vtanh.f32 %v910_v13  ;;  %v1454_v15 = vmul.f32 -1.442695, %v910_v13 }
 0x7c0   : > { %1808 = vpow2.f32 %v1452_v25 }
 0x7c1   : > { %1810 = vpow2.f32 %v1454_v15 }
 0x7c5   : > { %v1805_v21 = vpop.eup %1804 }
 0x7c6   : > { %810 = vrot.lane.b32.xlu0 %v1805_v21, %s1922_s11 }
 0x7c9   : > { %v1807_v27 = vpop.eup %1806 }
 0x7ca   : > { %920 = vrot.lane.b32.xlu1 %v1807_v27, %s1922_s11  ;;  %v1809_v16 = vpop.eup %1808 }
 0x7cb   : > { %v804_v18 = vadd.f32 1.0, %v1809_v16  ;;  %v1811_v19 = vpop.eup %1810 }
 0x7cc   : > { %v914_v23 = vadd.f32 1.0, %v1811_v19 }
 0x7cd   : > { %1812 = vrcp.f32 %v804_v18 }
 0x7ce   : > { %1814 = vrcp.f32 %v914_v23 }
 0x7d7   : > { %v1813_v26 = vpop.eup %1812 }
 0x7d8   : > { %v1815_v30 = vpop.eup %1814  ;;  %v808_v41 = vmul.f32 %v1813_v26, %v2206_v55 }
 0x7d9   : > { %v918_v44 = vmul.f32 %v1815_v30, %v2210_v58 }
 0x838   : > { %v811_v28 = vpop.permute.xlu0 %810 }
 0x839   : > { %v813_v29 = vmul.f32 %v1813_v26, %v811_v28 }
 0x83b   : > { %815 = vrot.lane.b32.xlu0 %v813_v29, %s1919_s3 }
 0x83c   : > { %v921_v39 = vpop.permute.xlu1 %920 }
 0x83d   : > { %v923_v40 = vmul.f32 %v1815_v30, %v921_v39  ;;  %v1464_v39 = vld [vmem:[%s2327_s4 + $0x20] sm:$0xff] (%p240_p0) }
 0x83f   : > { %925 = vrot.lane.b32.xlu1 %v923_v40, %s1919_s3  ;;  %v1465_v40 = vld [vmem:[%s2327_s4 + $0x28] sm:$0xff] (%p240_p0) }
 0x8ad   : > { %v816_v42 = vpop.permute.xlu0 %815 }
 0x8ae   : > { %v818_v43 = vadd.f32 %v816_v42, %v808_v41  ;;  %v1466_v41 = vld [vmem:[%s2327_s4 + $0x30] sm:$0xff] (%p240_p0)  ;;  %v1923_v42 = vmov (%p240_p0), 0.0|0.0  }
 0x8af   :  { %1688 = vmatprep.subr.bf16.mxu0 (%p240_p0), %v1923_v42  ;;  %1694 = vmatprep.subr.bf16.mxu1 (%p240_p0), %v1923_v42 }
 0x8b0   : > { %1816 = vtanh.f32 %v818_v43 }
 0x8b1   : > { %v926_v45 = vpop.permute.xlu1 %925 }
 0x8b2   : > { %v928_v46 = vadd.f32 %v926_v45, %v918_v44  ;;  %v1698_v44 = vpack.c.bf16 (%p240_p0), %v1169_v38, %v1168_v37 }
 0x8b4   : > { %1818 = vtanh.f32 %v928_v46 }
 0x8ba   : > { %v1817_v47 = vpop.eup %1816 }
 0x8bb   : > { %821 = vrot.lane.b32.xlu0 %v1817_v47, %s1922_s11 }
 0x8be   : > { %v1819_v48 = vpop.eup %1818 }
 0x8bf   : > { %931 = vrot.lane.b32.xlu1 %v1819_v48, %s1922_s11 }
 0x92d   : > { %v822_v49 = vpop.permute.xlu0 %821 }
 0x92e   : > { %v824_v50 = vmul.f32 %v1813_v26, %v822_v49  ;;  %v1470_v49 = vld [vmem:[%s2328_s5] ss:$0 sm:$0xff] (%p240_p0) }
 0x930   : > { %v935_v51 = vadd.f32 %v824_v50, %v2217_v1  ;;  %v954_v52 = vrot.slane %v824_v50, %v2068_v62  ;;  %v1137_v1 = vrot.slane %v946_v60, 2 }
 0x931   : > { %v932_v53 = vpop.permute.xlu1 %931 }
 0x932   : > { %v934_v54 = vmul.f32 %v1815_v30, %v932_v53  ;;  %955 = vrot.lane.b32.xlu0 %v954_v52, %s1919_s3 }
 0x934   : > { %v936_v55 = vadd.f32 %v934_v54, %v2223_v6  ;;  %v1061_v56 = vrot.slane %v934_v54, %v2068_v62 }
 0x936   : > { %1062 = vrot.lane.b32.xlu1 %v1061_v56, %s1919_s3 }
 0x9a4   : > { %v956_v57 = vpop.permute.xlu0 %955 }
 0x9a5   : > { %1605 = vmatmul.mubr.msk.f32.vlgmr.msra.gmra.mrb[6].mxu0 %vm57_vm0, %v956_v57 }
 0x9a6   :  { %1626 = vmatprep.mubr.msk.f32.mxu0 (%p240_p0), %vm1925_vm2, %v1926_v36 }
 0x9a8   : > { %v1063_v58 = vpop.permute.xlu1 %1062 }
 0x9a9   : > { %1616 = vmatmul.mubr.msk.f32.vlgmr.msra.gmra.mrb[6].mxu1 %vm57_vm0, %v1063_v58 }
 0x9aa   :  { %1637 = vmatprep.mubr.msk.f32.mxu1 (%p240_p0), %vm1925_vm2, %v1926_v36  ;;  %1696 = vmatpush3.bf16.msra.mxu1 (%p240_p0), %v1695_v35 }
 0x9ab   :  { %1697 = vmatprep.subr.bf16.mxu1 (%p240_p0), %v1923_v42 }
 0x9ae   :  { %1699 = vmatpush3.bf16.msra.mxu1 (%p240_p0), %v1698_v44 }
 0xa78   : > { %v1025_v61 = vpop.f32.mrb[6].mxu0 }
 0xa79   : > { %v1029_v63 = vadd.f32 %v1457_v59, %v1025_v61  ;;  %v1606_v0 = vpop.f32.mrb[7].mxu0 }
 0xa7b   : > { %1820 = vtanh.f32 %v1029_v63  ;;  %v1461_v8 = vmul.f32 -1.442695, %v1029_v63 }
 0xa7c   : > { %v1132_v2 = vpop.f32.mrb[6].mxu1 }
 0xa7d   : > { %v1139_v3 = vadd.f32 %v1137_v1, %v1132_v2  ;;  %v1617_v4 = vpop.f32.mrb[7].mxu1 }
 0xa7f   : > { %1822 = vtanh.f32 %v1139_v3  ;;  %v1463_v17 = vmul.f32 -1.442695, %v1139_v3 }
 0xa80   : > { %1824 = vpow2.f32 %v1461_v8 }
 0xa81   : > { %1826 = vpow2.f32 %v1463_v17 }
 0xa85   : > { %v1821_v5 = vpop.eup %1820 }
 0xa86   : > { %1039 = vrot.lane.b32.xlu0 %v1821_v5, %s1922_s11 }
 0xa89   : > { %v1823_v6 = vpop.eup %1822 }
 0xa8a   : > { %1149 = vrot.lane.b32.xlu1 %v1823_v6, %s1922_s11  ;;  %v1825_v14 = vpop.eup %1824 }
 0xa8b   : > { %v1033_v20 = vadd.f32 1.0, %v1825_v14  ;;  %v1827_v7 = vpop.eup %1826 }
 0xa8c   : > { %v1143_v9 = vadd.f32 1.0, %v1827_v7 }
 0xa8d   : > { %1828 = vrcp.f32 %v1033_v20 }
 0xa8e   : > { %1830 = vrcp.f32 %v1143_v9 }
 0xa97   : > { %v1829_v10 = vpop.eup %1828 }
 0xa98   : > { %v1831_v24 = vpop.eup %1830  ;;  %v1037_v21 = vmul.f32 %v1829_v10, %v818_v43  ;;  %v1689_v43 = vpack.c.bf16 (%p240_p0), %v1465_v40, %v1464_v39 }
 0xa99   : > { %v1147_v25 = vmul.f32 %v1831_v24, %v928_v46 }
 0xa9a   :  { %1690 = vmatpush3.bf16.msra.mxu0 (%p240_p0), %v1689_v43 }
 0xa9b   :  { %1691 = vmatprep.subr.bf16.mxu0 (%p240_p0), %v1923_v42 }
 0xaf8   : > { %v1040_v11 = vpop.permute.xlu0 %1039 }
 0xaf9   : > { %v1042_v12 = vmul.f32 %v1829_v10, %v1040_v11 }
 0xafb   : > { %1044 = vrot.lane.b32.xlu0 %v1042_v12, %s1919_s3 }
 0xafc   : > { %v1150_v13 = vpop.permute.xlu1 %1149 }
 0xafd   : > { %v1152_v22 = vmul.f32 %v1831_v24, %v1150_v13 }
 0xaff   : > { %1154 = vrot.lane.b32.xlu1 %v1152_v22, %s1919_s3 }
 0xb6d   : > { %v1045_v27 = vpop.permute.xlu0 %1044 }
 0xb6e   : > { %v1047_v18 = vadd.f32 %v1045_v27, %v1037_v21  }
 0xb70   : > { %1832 = vtanh.f32 %v1047_v18  ;;  %v1692_v18 = vpack.c.bf16 (%p240_p0), %v1467_v31, %v1466_v41 }
 0xb71   : > { %v1155_v15 = vpop.permute.xlu1 %1154 }
 0xb72   : > { %v1157_v15 = vadd.f32 %v1155_v15, %v1147_v25   ;;  %1693 = vmatpush3.bf16.msra.mxu0 (%p240_p0), %v1692_v18 }
 0xb74   : > { %1834 = vtanh.f32 %v1157_v15 }
 0xb7a   : > { %v1833_v16 = vpop.eup %1832 }
 0xb7b   : > { %1050 = vrot.lane.b32.xlu0 %v1833_v16, %s1922_s11 }
 0xb7e   : > { %v1835_v19 = vpop.eup %1834 }
 0xb7f   : > { %1160 = vrot.lane.b32.xlu1 %v1835_v19, %s1922_s11  ;;  %s1927_s11 = smov (%p240_p0), [#allocation3]  }
 0xb80   :  { %s1355_s12 = sshll.u32 (%p240_p0), %s1927_s11, 4  ;;  %s1356_s12 = int_to_ptr.vmem [resolvable:$true] %s1355_s12 }
 0xb81   :  { %s1836_s1 = scalar_lea.vmem (%p240_p0), %s1356_s12, 32  ;;  %p1841_p2 = scmp.lt.s32.totalorder (%p240_p0), %s1356_s12, %s1356_s12 }
 0xb82   :  { %p1837_p1 = scmp.ne.s32.totalorder (%p240_p0), %s1356_s12, %s1836_s1  ;;  %p1842_p3 = scmp.lt.s32.totalorder (%p240_p0), %s1836_s1, %s1836_s1 }
 0xb84   :  { %p1843_p4 = por (%p240_p0), %p1842_p3, %p1841_p2 }
 0xb86   :  { %p1844_p5 = pnand (%p240_p0), %p1843_p4, %p1837_p1 }
 0xbed   : > { %v1051_v23 = vpop.permute.xlu0 %1050 }
 0xbee   : > { %v1053_v19 = vmul.f32 %v1829_v10, %v1051_v23  }
 0xbf0   : > { %v1164_v26 = vadd.f32 %v1053_v19, %v935_v51   ;;  %242 = sbr.rel (!%p240_p0) target bundleno = 239 (0xef), region = 70 }
 0xbf1   : > { %v1161_v28 = vpop.permute.xlu1 %1160 }
 0xbf2   : > { %v1163_v16 = vmul.f32 %v1831_v24, %v1161_v28   ;;  %v2331_v17 = vmov %v1164_v26  ;;  %v1264_v34 = vrot.slane (%p240_p0), %v1164_v26, %v2068_v62 }
 0xbf4   : > { %v1165_v29 = vadd.f32 %v1163_v16, %v936_v55  }
 0xbf6   : > { %v2330_v14 = vmov %v1165_v29  ;;  %v1182_v30 = vrot.slane (%p240_p0), %v1165_v29, %v2068_v62 }
 0xbf8   :  { %1183 = vrot.lane.b32.xlu0 %v1182_v30, %s1924_s29 }
 0xbfc   :  { %1265 = vrot.lane.b32.xlu0 %v1264_v34, %s1924_s29 }
 0xc6a   :  { %v1184_v62 = vpop.permute.xlu0 %1183 }
 0xc6b   :  { %1627 = vmatmul.mubr.msk.f32.vlgmr.msra.gmra.mrb[0].mxu0 %vm57_vm0, %v1184_v62 }
 0xc6e   :  { %v1266_v45 = vpop.permute.xlu0 %1265 }
 0xc6f   :  { %1638 = vmatmul.mubr.msk.f32.vlgmr.msra.gmra.mrb[0].mxu1 %vm57_vm0, %v1266_v45 }
 0xd3e   :  { %v1253_v46 = vpop.f32.mrb[0].mxu0 }
 0xd3f   :  { %v1628_v47 = vpop.f32.mrb[1].mxu0 }
 0xd42   :  { %v1335_v48 = vpop.f32.mrb[0].mxu1 }
 0xd43   :  { %v1336_v50 = vadd.f32 %v1335_v48, %v1253_v46  ;;  %v1639_v51 = vpop.f32.mrb[1].mxu1 }
 0xd45   :  { %v1346_v52 = vadd.f32 %v1470_v49, %v1336_v50 }
 0xd47   :  { %1348 = vst.msk [vmem:[#allocation3] sm:$0x3] %vm1347_vm3, %v1346_v52 }
 0xd48   :  { %1847 = shalt.err (!%p1844_p5)
}
 0xd49   :  { %s1848_s15 = scalar_lea.hbm %s2329_s6, 32 }
 0xd4a   :  { %p1849_p6 = scmp.ne.s32.totalorder %s2329_s6, %s1848_s15  ;;  %p1852_p7 = scmp.lt.u32.totalorder %s1848_s15, %s2329_s6 }
 0xd4c   :  { %p1854_p8 = pnand %p1852_p7, %p1849_p6 }
 0xd4e   :  { %1857 = shalt.err (!%p1854_p8)
}
 0xd4f   :  { %1358 = dma.vmem_to_hbm [thread:$0]  %s1356_s12, 32, %s2329_s6, [#allocation4]  }
 0xd50   :  { %1886 = dma.done.wait [#allocation4], 32  }
 0xd51   :  { %1887 = vsyncadd [#allocation4], 4294967264 }
 0xd52   :  { %1362 = vsyncpa [#allocation4], 1 }

</bundles_post_ra>
